<compile_context>
chip_gen: v5e
topology: v5e:2x2
jax: 0.10.0
libtpu: 0.0.40
codegen_flags: <defaults>
</compile_context>

<pallas_src>
import numpy as np

import jax
import jax.numpy as jnp
from jax.experimental import pallas as pl
from jax.experimental.pallas import tpu as pltpu

# ----------------------------- model config ---------------------------------
IMAGE_SHAPE = (4, 16, 16)      # (C, H, W)
CHANNELS = (8, 16)
KERNELS = (4, 3)
STRIDES = (2, 1)
PADDINGS = (0, 1)
FC_SIZE = 32                   # fc_sizes (hidden MLP of Conv2dHeadModel)
OUTPUT_SIZE = 6                # number of actions
NUM_OPTIONS = 4
# use_interest=False  ->  I = Dummy(num_options)  ->  interest == ones
HEAD_WIDTH = NUM_OPTIONS * OUTPUT_SIZE + 3 * NUM_OPTIONS   # pi | q | beta | pi_omega = 36

# TODO(synk): rlpyt's infer/restore_leading_dims ([T,B]/[B]/[] handling) is
# host-side bookkeeping; this wrapper assumes a single [B] leading dim.


# ----------------------------- fused Pallas kernel ---------------------------
def _fused_forward_kernel(x_ref, w1b_ref, w2b_ref, fcw_ref, hw_ref, bias_ref,
                          out_ref, pad_ref):
    """Entire forward pass, fully resident in VMEM.

    x_ref    : (B, 8, 128) f32  space-to-depth image; lane = col*16 + (p,q,c)
    w1b_ref  : (2, 128, 56) bf16 banded conv1 weights (one band per kernel row di)
    w2b_ref  : (3, 72, 112) bf16 banded conv2 weights (one band per kernel row di)
    fcw_ref  : (7, 112, 32) bf16 fc weights, split per conv2 output row
    hw_ref   : (32, 36)     bf16 fused head weights [pi(24) | q(4) | beta(4) | pi_omega(4)]
    bias_ref : (4, 128)     f32  row0=conv1 bias tiled(56), row1=conv2 bias tiled(112),
                                 row2=fc bias(32), row3=head bias(36)
    out_ref  : (B, 36)      f32  single lane-dense output slab
    pad_ref  : (B, 9, 72)   f32  scratch: zero-padded conv1 output, lane = col*8 + c
    """
    B = x_ref.shape[0]
    O, A = NUM_OPTIONS, OUTPUT_SIZE
    C1, C2 = CHANNELS

    b1 = bias_ref[0:1, 0:7 * C1]          # (1, 56)
    b2 = bias_ref[1:2, 0:7 * C2]          # (1, 112)
    fcb = bias_ref[2:3, 0:FC_SIZE]        # (1, 32)
    hb = bias_ref[3:4, 0:HEAD_WIDTH]      # (1, 36)

    # Zero the padded scratch once (gives conv2 its padding=1 ring).
    pad_ref[...] = jnp.zeros(pad_ref.shape, pad_ref.dtype)

    # ---- conv1 (4x4 / stride-2, via 2x2 / stride-1 on the s2d image):
    # two banded (7,128)x(128,56) MXU matmuls per batch element produce the
    # whole 7x7x8 output plane lane-densely (lane = ow*8 + c_out); ReLU; one
    # (7,56) store into the interior of the padded scratch.
    for b in range(B):
        acc = jnp.zeros((7, 7 * C1), jnp.float32)
        for di in range(2):
            acc = acc + jnp.dot(x_ref[b, di:di + 7, :].astype(jnp.bfloat16),
                                w1b_ref[di], preferred_element_type=jnp.float32)
        pad_ref[b, 1:8, C1:8 * C1] = jnp.maximum(acc + b1, 0.0)

    # ---- conv2 (3x3 / stride-1 / pad-1): three banded (7,72)x(72,112) MXU
    # matmuls per batch element; the ReLU'd (7,112) plane (lane = ow*16 + c)
    # stays in registers and feeds the fc directly (no flat scratch, no
    # scatter stores).
    h2 = []
    for b in range(B):
        acc = jnp.zeros((7, 7 * C2), jnp.float32)
        for di in range(3):
            acc = acc + jnp.dot(pad_ref[b, di:di + 7, :].astype(jnp.bfloat16),
                                w2b_ref[di], preferred_element_type=jnp.float32)
        h2.append(jnp.maximum(acc + b2, 0.0))                  # (7, 112) f32

    # ---- fc (784 -> 32) + ReLU: 7 accumulated (B,112)x(112,32) matmuls; the
    # fc weight is pre-split per conv2 output row so no flattening is needed.
    fc = jnp.zeros((B, FC_SIZE), jnp.float32)
    for oh in range(7):
        rows = jnp.concatenate([v[oh:oh + 1, :] for v in h2], axis=0)    # (B, 112)
        fc = fc + jnp.dot(rows.astype(jnp.bfloat16), fcw_ref[oh],
                          preferred_element_type=jnp.float32)
    fc = jnp.maximum(fc + fcb, 0.0)                                       # (B, 32) f32

    # ---- all four heads: one fused matmul -> (B, 36) logits slab.
    z = jnp.dot(fc.astype(jnp.bfloat16), hw_ref[...],
                preferred_element_type=jnp.float32) + hb                  # (B, 36)

    # DiscreteIntraOptionPolicy: per-option softmax over the A action logits.
    # Exact division (the previous approx reciprocal broke sum(pi)==1).
    for o in range(O):
        lo = o * A
        g = z[:, lo:lo + A]
        g = g - jnp.max(g, axis=-1, keepdims=True)
        e = jnp.exp(g)
        out_ref[:, lo:lo + A] = e / jnp.sum(e, axis=-1, keepdims=True)

    # q head: plain linear.
    out_ref[:, O * A:O * A + O] = z[:, O * A:O * A + O]

    # beta head: sigmoid (exact division).
    bz = z[:, O * A + O:O * A + 2 * O]
    out_ref[:, O * A + O:O * A + 2 * O] = 1.0 / (1.0 + jnp.exp(-bz))

    # pi_omega head: softmax over options.  use_interest=False -> interest == 1,
    # so pi_I == pi_omega (interest multiply intentionally dropped).
    po = z[:, O * A + 2 * O:O * A + 3 * O]
    po = po - jnp.max(po, axis=-1, keepdims=True)
    pe = jnp.exp(po)
    out_ref[:, O * A + 2 * O:] = pe / jnp.sum(pe, axis=-1, keepdims=True)


def _fused_call(x, w1b, w2b, fcw3, head_w, bias):
    n = x.shape[0]

    def full(a):
        return pl.BlockSpec(a.shape, lambda i, nd=a.ndim: (0,) * nd)

    return pl.pallas_call(
        _fused_forward_kernel,
        out_shape=jax.ShapeDtypeStruct((n, HEAD_WIDTH), jnp.float32),
        grid=(1,),
        in_specs=[full(x), full(w1b), full(w2b), full(fcw3), full(head_w), full(bias)],
        out_specs=pl.BlockSpec((n, HEAD_WIDTH), lambda i: (0, 0)),
        scratch_shapes=[pltpu.VMEM((n, 9, 9 * CHANNELS[0]), jnp.float32)],
        compiler_params=pltpu.CompilerParams(dimension_semantics=("arbitrary",)),
    )(x, w1b, w2b, fcw3, head_w, bias)


# ----------------------------- one-off param packing -------------------------
def pack_params(params):
    """Pre-pack all weights for the fused kernel (called ONCE, outside jit).

    conv1/conv2 are turned into banded (Toeplitz) matrices so that each conv
    is a couple of full-plane matmuls on lane-dense operands inside the
    kernel; the fc weight is split per conv2 output row; the four heads are
    fused; all biases share one (4,128) f32 slab.
    """
    bf = jnp.bfloat16
    (w1, b1), (w2, b2) = params["conv"]
    w1 = np.asarray(w1, np.float32)        # (4,4,4,8)  HWIO
    w2 = np.asarray(w2, np.float32)        # (3,3,8,16) HWIO
    b1 = np.asarray(b1, np.float32)
    b2 = np.asarray(b2, np.float32)
    C1, C2 = CHANNELS

    # conv1 -> space-to-depth(2) form: w1s[di, dj, (p*2+q)*4+c, o]
    w1s = (w1.reshape(2, 2, 2, 2, 4, C1)
             .transpose(0, 2, 1, 3, 4, 5)
             .reshape(2, 2, 16, C1))
    # banded conv1 weights: (di, col*16+e, ow*8+o)
    w1b = np.zeros((2, 8 * 16, 7 * C1), np.float32)
    for di in range(2):
        for ow in range(7):
            for dj in range(2):
                col = ow + dj
                w1b[di, col * 16:(col + 1) * 16, ow * C1:(ow + 1) * C1] = w1s[di, dj]

    # banded conv2 weights: (di, col*8+ci, ow*16+o), col indexes the padded plane
    w2b = np.zeros((3, 9 * C1, 7 * C2), np.float32)
    for di in range(3):
        for ow in range(7):
            for dj in range(3):
                col = ow + dj
                w2b[di, col * C1:(col + 1) * C1, ow * C2:(ow + 1) * C2] = w2[di, dj]

    # fc weights split per conv2 output row (row-major (oh, ow, c) flatten).
    fcw3 = np.asarray(params["fc_w"], np.float32).reshape(7, 7 * C2, FC_SIZE)

    # fused heads: [pi(24) | q(4) | beta(4) | pi_omega(4)]
    head_w = np.concatenate([np.asarray(params["pi_w"]), np.asarray(params["q_w"]),
                             np.asarray(params["beta_w"]), np.asarray(params["po_w"])],
                            axis=1).astype(np.float32)
    head_b = np.concatenate([np.asarray(params["pi_b"]), np.asarray(params["q_b"]),
                             np.asarray(params["beta_b"]), np.asarray(params["po_b"])],
                            axis=0).astype(np.float32)

    # all biases in one lane-aligned f32 slab
    bias = np.zeros((4, 128), np.float32)
    bias[0, :7 * C1] = np.tile(b1, 7)
    bias[1, :7 * C2] = np.tile(b2, 7)
    bias[2, :FC_SIZE] = np.asarray(params["fc_b"], np.float32)
    bias[3, :HEAD_WIDTH] = head_b

    return {
        "w1b": jnp.asarray(w1b, bf),
        "w2b": jnp.asarray(w2b, bf),
        "fcw3": jnp.asarray(fcw3, bf),
        "head_w": jnp.asarray(head_w, bf),
        "bias": jnp.asarray(bias),
    }


# ----------------------------- forward wrapper -------------------------------
def miniworld_oc_ff_forward(image, prev_action, prev_reward, packed):
    """image: uint8 [B, C, H, W].  Returns (pi, q, beta, pi_I) with leading [B]."""
    del prev_action, prev_reward                       # unused by the module's forward
    n = image.shape[0]

    # Minimal image layout glue (~2 KB): uint8 NCHW -> f32/255 NHWC -> 2x2
    # space-to-depth with (col, p, q, c) flattened into 128 lanes so conv1 is
    # a banded matmul on contiguous slices inside the kernel.
    x = image.astype(jnp.float32) * (1.0 / 255.0)
    x = jnp.transpose(x, (0, 2, 3, 1))                                    # (B,16,16,4)
    x = x.reshape(n, 8, 2, 8, 2, 4).transpose(0, 1, 3, 2, 4, 5)           # (B,8,8,2,2,4)
    x = x.reshape(n, 8, 128)                                              # (B,8,128) f32

    out = _fused_call(x, packed["w1b"], packed["w2b"], packed["fcw3"],
                      packed["head_w"], packed["bias"])

    O, A = NUM_OPTIONS, OUTPUT_SIZE
    pi = out[:, :O * A].reshape(n, O, A)
    q = out[:, O * A:O * A + O]
    beta = out[:, O * A + O:O * A + 2 * O]
    pi_I = out[:, O * A + 2 * O:]
    return pi, q, beta, pi_I


# ----------------------------- params & reference ----------------------------
def init_params(key):
    keys = iter(jax.random.split(key, 20))
    params = {"conv": []}
    c_in, h, w = IMAGE_SHAPE
    for c_out, k, s, p in zip(CHANNELS, KERNELS, STRIDES, PADDINGS):
        fan_in = k * k * c_in
        cw = jax.random.normal(next(keys), (k, k, c_in, c_out), jnp.float32) * (fan_in ** -0.5)
        cb = jax.random.uniform(next(keys), (c_out,), jnp.float32, -0.05, 0.05)
        params["conv"].append((cw, cb))
        c_in = c_out
        h = (h + 2 * p - k) // s + 1
        w = (w + 2 * p - k) // s + 1
    conv_out = h * w * c_in

    def lin(n_in, n_out):
        wgt = jax.random.normal(next(keys), (n_in, n_out), jnp.float32) * (n_in ** -0.5)
        bias = jax.random.uniform(next(keys), (n_out,), jnp.float32, -0.05, 0.05)
        return wgt, bias

    params["fc_w"], params["fc_b"] = lin(conv_out, FC_SIZE)
    params["pi_w"], params["pi_b"] = lin(FC_SIZE, NUM_OPTIONS * OUTPUT_SIZE)
    params["q_w"], params["q_b"] = lin(FC_SIZE, NUM_OPTIONS)
    params["beta_w"], params["beta_b"] = lin(FC_SIZE, NUM_OPTIONS)
    params["po_w"], params["po_b"] = lin(FC_SIZE, NUM_OPTIONS)
    return params


def reference_forward(image, params):
    """Pure-JAX reference mirroring the kernel's numerics
    (bf16 matmul/conv operands, f32 accumulation, f32 element-wise math)."""
    x = image.astype(jnp.float32) / 255.0
    x = jnp.transpose(x, (0, 2, 3, 1))
    for (cw, cb), s, p in zip(params["conv"], STRIDES, PADDINGS):
        x = jax.lax.conv_general_dilated(
            x.astype(jnp.bfloat16), cw.astype(jnp.bfloat16), (s, s), [(p, p), (p, p)],
            dimension_numbers=("NHWC", "HWIO", "NHWC"),
            preferred_element_type=jnp.float32)
        x = jnp.maximum(x + cb, 0.0)
    flat = x.reshape(x.shape[0], -1)                       # (H, W, C)-ordered flatten
    fc = jnp.maximum(
        jnp.dot(flat.astype(jnp.bfloat16), params["fc_w"].astype(jnp.bfloat16),
                preferred_element_type=jnp.float32) + params["fc_b"], 0.0)
    b = fc.shape[0]
    fc16 = fc.astype(jnp.bfloat16)

    def head(w, bias):
        return jnp.dot(fc16, w.astype(jnp.bfloat16),
                       preferred_element_type=jnp.float32) + bias

    pi = jax.nn.softmax(
        head(params["pi_w"], params["pi_b"]).reshape(b, NUM_OPTIONS, OUTPUT_SIZE), axis=-1)
    q = head(params["q_w"], params["q_b"])
    beta = jax.nn.sigmoid(head(params["beta_w"], params["beta_b"]))
    pi_o = jax.nn.softmax(head(params["po_w"], params["po_b"]), axis=-1)
    return pi, q, beta, pi_o                               # use_interest=False -> pi_I == pi_omega


# ----------------------------------- main ------------------------------------
if __name__ == "__main__":
    key = jax.random.PRNGKey(0)
    pkey, ikey = jax.random.split(key)
    params = init_params(pkey)
    packed = pack_params(params)       # one-off packing, hoisted out of the jitted forward

    B = 2
    image = jax.random.randint(ikey, (B,) + IMAGE_SHAPE, 0, 256, dtype=jnp.int32).astype(jnp.uint8)
    prev_action = jnp.zeros((B,), jnp.int32)
    prev_reward = jnp.zeros((B,), jnp.float32)

    fwd = jax.jit(miniworld_oc_ff_forward)
    pi, q, beta, pi_I = fwd(image, prev_action, prev_reward, packed)
    jax.block_until_ready((pi, q, beta, pi_I))

    # shape checks
    assert pi.shape == (B, NUM_OPTIONS, OUTPUT_SIZE)
    assert q.shape == (B, NUM_OPTIONS)
    assert beta.shape == (B, NUM_OPTIONS)
    assert pi_I.shape == (B, NUM_OPTIONS)

    # numerical check against the pure-JAX reference (2e-3 covers bf16
    # double-rounding between two valid f32 summation orders)
    rpi, rq, rbeta, rpiI = reference_forward(image, params)
    for a, r in ((pi, rpi), (q, rq), (beta, rbeta), (pi_I, rpiI)):
        assert jnp.allclose(a, r, atol=2e-3, rtol=2e-3), "mismatch vs reference"
    # softmax rows sum to one (exact division in the kernel)
    assert jnp.allclose(jnp.sum(pi, axis=-1), 1.0, atol=1e-3)
    assert jnp.allclose(jnp.sum(pi_I, axis=-1), 1.0, atol=1e-3)

    print("KERNEL_OK")
</pallas_src>

<mosaic_0001>
module attributes {stable_mosaic.version = 11 : i64} {
  func.func @_fused_forward_kernel(%arg0: i32, %arg1: memref<2x8x128xf32, #tpu.memory_space<vmem>>, %arg2: memref<2x128x56xbf16, #tpu.memory_space<vmem>>, %arg3: memref<3x72x112xbf16, #tpu.memory_space<vmem>>, %arg4: memref<7x112x32xbf16, #tpu.memory_space<vmem>>, %arg5: memref<32x36xbf16, #tpu.memory_space<vmem>>, %arg6: memref<4x128xf32, #tpu.memory_space<vmem>>, %arg7: memref<2x36xf32, #tpu.memory_space<vmem>>, %arg8: memref<2x9x72xf32, #tpu.memory_space<vmem>>) attributes {dimension_semantics = [#tpu.dimension_semantics<arbitrary>], iteration_bounds = array<i64: 1>, scalar_prefetch = 0 : i64, scratch_operands = 1 : i64, tpu.core_type = #tpu.core_type<tc>, window_params = [{pipeline_mode = #tpu.pipeline_mode<synchronous>, transform_indices = @transform_0, window_bounds = array<i64: 2, 8, 128>}, {pipeline_mode = #tpu.pipeline_mode<synchronous>, transform_indices = @transform_1, window_bounds = array<i64: 2, 128, 56>}, {pipeline_mode = #tpu.pipeline_mode<synchronous>, transform_indices = @transform_2, window_bounds = array<i64: 3, 72, 112>}, {pipeline_mode = #tpu.pipeline_mode<synchronous>, transform_indices = @transform_3, window_bounds = array<i64: 7, 112, 32>}, {pipeline_mode = #tpu.pipeline_mode<synchronous>, transform_indices = @transform_4, window_bounds = array<i64: 32, 36>}, {pipeline_mode = #tpu.pipeline_mode<synchronous>, transform_indices = @transform_5, window_bounds = array<i64: 4, 128>}, {pipeline_mode = #tpu.pipeline_mode<synchronous>, transform_indices = @transform_6, window_bounds = array<i64: 2, 36>}]} {
    %c0 = arith.constant 0 : index
    %c0_0 = arith.constant 0 : index
    %0 = vector.load %arg6[%c0, %c0_0] : memref<4x128xf32, #tpu.memory_space<vmem>>, vector<1x56xf32>
    %c1 = arith.constant 1 : index
    %c0_1 = arith.constant 0 : index
    %1 = vector.load %arg6[%c1, %c0_1] : memref<4x128xf32, #tpu.memory_space<vmem>>, vector<1x112xf32>
    %c2 = arith.constant 2 : index
    %c0_2 = arith.constant 0 : index
    %2 = vector.load %arg6[%c2, %c0_2] : memref<4x128xf32, #tpu.memory_space<vmem>>, vector<1x32xf32>
    %c3 = arith.constant 3 : index
    %c0_3 = arith.constant 0 : index
    %3 = vector.load %arg6[%c3, %c0_3] : memref<4x128xf32, #tpu.memory_space<vmem>>, vector<1x36xf32>
    %cst = arith.constant 0.000000e+00 : f32
    %4 = vector.broadcast %cst : f32 to vector<2x9x72xf32>
    %c0_4 = arith.constant 0 : index
    %c0_5 = arith.constant 0 : index
    %c0_6 = arith.constant 0 : index
    %5 = vector.load %arg8[%c0_4, %c0_5, %c0_6] : memref<2x9x72xf32, #tpu.memory_space<vmem>>, vector<2x9x72xf32>
    tpu.vector_store %arg8[%c0_4, %c0_5, %c0_6], %4 {strides = array<i32>} : memref<2x9x72xf32, #tpu.memory_space<vmem>>, vector<2x9x72xf32>,
    %cst_7 = arith.constant 0.000000e+00 : f32
    %6 = vector.broadcast %cst_7 : f32 to vector<7x56xf32>
    %c0_8 = arith.constant 0 : index
    %c0_9 = arith.constant 0 : index
    %c0_10 = arith.constant 0 : index
    %7 = vector.load %arg1[%c0_8, %c0_9, %c0_10] : memref<2x8x128xf32, #tpu.memory_space<vmem>>, vector<1x7x128xf32>
    %8 = vector.shape_cast %7 : vector<1x7x128xf32> to vector<7x128xf32>
    %9 = arith.truncf %8 : vector<7x128xf32> to vector<7x128xbf16>
    %c0_11 = arith.constant 0 : index
    %c0_12 = arith.constant 0 : index
    %c0_13 = arith.constant 0 : index
    %10 = vector.load %arg2[%c0_11, %c0_12, %c0_13] : memref<2x128x56xbf16, #tpu.memory_space<vmem>>, vector<1x128x56xbf16>
    %11 = vector.shape_cast %10 : vector<1x128x56xbf16> to vector<128x56xbf16>
    %cst_14 = arith.constant dense<0.000000e+00> : vector<7x56xf32>
    %12 = tpu.matmul %9, %11, %cst_14 {dimension_numbers = #tpu.dot_dimension_numbers<[1], [0], [0], [1], [0, 0, 1, 1], [], []>} : vector<7x128xbf16>, vector<128x56xbf16>, vector<7x56xf32> -> vector<7x56xf32>
    %13 = arith.addf %6, %12 : vector<7x56xf32>
    %c0_15 = arith.constant 0 : index
    %c1_16 = arith.constant 1 : index
    %c0_17 = arith.constant 0 : index
    %14 = vector.load %arg1[%c0_15, %c1_16, %c0_17] : memref<2x8x128xf32, #tpu.memory_space<vmem>>, vector<1x7x128xf32>
    %15 = vector.shape_cast %14 : vector<1x7x128xf32> to vector<7x128xf32>
    %16 = arith.truncf %15 : vector<7x128xf32> to vector<7x128xbf16>
    %c1_18 = arith.constant 1 : index
    %c0_19 = arith.constant 0 : index
    %c0_20 = arith.constant 0 : index
    %17 = vector.load %arg2[%c1_18, %c0_19, %c0_20] : memref<2x128x56xbf16, #tpu.memory_space<vmem>>, vector<1x128x56xbf16>
    %18 = vector.shape_cast %17 : vector<1x128x56xbf16> to vector<128x56xbf16>
    %cst_21 = arith.constant dense<0.000000e+00> : vector<7x56xf32>
    %19 = tpu.matmul %16, %18, %cst_21 {dimension_numbers = #tpu.dot_dimension_numbers<[1], [0], [0], [1], [0, 0, 1, 1], [], []>} : vector<7x128xbf16>, vector<128x56xbf16>, vector<7x56xf32> -> vector<7x56xf32>
    %20 = arith.addf %13, %19 : vector<7x56xf32>
    %21 = vector.broadcast %0 : vector<1x56xf32> to vector<7x56xf32>
    %22 = arith.addf %20, %21 : vector<7x56xf32>
    %cst_22 = arith.constant 0.000000e+00 : f32
    %23 = vector.broadcast %cst_22 : f32 to vector<7x56xf32>
    %24 = arith.maximumf %22, %23 : vector<7x56xf32>
    %c0_23 = arith.constant 0 : index
    %c1_24 = arith.constant 1 : index
    %c8 = arith.constant 8 : index
    %25 = vector.load %arg8[%c0_23, %c1_24, %c8] : memref<2x9x72xf32, #tpu.memory_space<vmem>>, vector<1x7x56xf32>
    %26 = vector.shape_cast %25 : vector<1x7x56xf32> to vector<7x56xf32>
    %27 = vector.shape_cast %24 : vector<7x56xf32> to vector<1x7x56xf32>
    tpu.vector_store %arg8[%c0_23, %c1_24, %c8], %27 {strides = array<i32>} : memref<2x9x72xf32, #tpu.memory_space<vmem>>, vector<1x7x56xf32>,
    %cst_25 = arith.constant 0.000000e+00 : f32
    %28 = vector.broadcast %cst_25 : f32 to vector<7x56xf32>
    %c1_26 = arith.constant 1 : index
    %c0_27 = arith.constant 0 : index
    %c0_28 = arith.constant 0 : index
    %29 = vector.load %arg1[%c1_26, %c0_27, %c0_28] : memref<2x8x128xf32, #tpu.memory_space<vmem>>, vector<1x7x128xf32>
    %30 = vector.shape_cast %29 : vector<1x7x128xf32> to vector<7x128xf32>
    %31 = arith.truncf %30 : vector<7x128xf32> to vector<7x128xbf16>
    %c0_29 = arith.constant 0 : index
    %c0_30 = arith.constant 0 : index
    %c0_31 = arith.constant 0 : index
    %32 = vector.load %arg2[%c0_29, %c0_30, %c0_31] : memref<2x128x56xbf16, #tpu.memory_space<vmem>>, vector<1x128x56xbf16>
    %33 = vector.shape_cast %32 : vector<1x128x56xbf16> to vector<128x56xbf16>
    %cst_32 = arith.constant dense<0.000000e+00> : vector<7x56xf32>
    %34 = tpu.matmul %31, %33, %cst_32 {dimension_numbers = #tpu.dot_dimension_numbers<[1], [0], [0], [1], [0, 0, 1, 1], [], []>} : vector<7x128xbf16>, vector<128x56xbf16>, vector<7x56xf32> -> vector<7x56xf32>
    %35 = arith.addf %28, %34 : vector<7x56xf32>
    %c1_33 = arith.constant 1 : index
    %c1_34 = arith.constant 1 : index
    %c0_35 = arith.constant 0 : index
    %36 = vector.load %arg1[%c1_33, %c1_34, %c0_35] : memref<2x8x128xf32, #tpu.memory_space<vmem>>, vector<1x7x128xf32>
    %37 = vector.shape_cast %36 : vector<1x7x128xf32> to vector<7x128xf32>
    %38 = arith.truncf %37 : vector<7x128xf32> to vector<7x128xbf16>
    %c1_36 = arith.constant 1 : index
    %c0_37 = arith.constant 0 : index
    %c0_38 = arith.constant 0 : index
    %39 = vector.load %arg2[%c1_36, %c0_37, %c0_38] : memref<2x128x56xbf16, #tpu.memory_space<vmem>>, vector<1x128x56xbf16>
    %40 = vector.shape_cast %39 : vector<1x128x56xbf16> to vector<128x56xbf16>
    %cst_39 = arith.constant dense<0.000000e+00> : vector<7x56xf32>
    %41 = tpu.matmul %38, %40, %cst_39 {dimension_numbers = #tpu.dot_dimension_numbers<[1], [0], [0], [1], [0, 0, 1, 1], [], []>} : vector<7x128xbf16>, vector<128x56xbf16>, vector<7x56xf32> -> vector<7x56xf32>
    %42 = arith.addf %35, %41 : vector<7x56xf32>
    %43 = vector.broadcast %0 : vector<1x56xf32> to vector<7x56xf32>
    %44 = arith.addf %42, %43 : vector<7x56xf32>
    %cst_40 = arith.constant 0.000000e+00 : f32
    %45 = vector.broadcast %cst_40 : f32 to vector<7x56xf32>
    %46 = arith.maximumf %44, %45 : vector<7x56xf32>
    %c1_41 = arith.constant 1 : index
    %c1_42 = arith.constant 1 : index
    %c8_43 = arith.constant 8 : index
    %47 = vector.load %arg8[%c1_41, %c1_42, %c8_43] : memref<2x9x72xf32, #tpu.memory_space<vmem>>, vector<1x7x56xf32>
    %48 = vector.shape_cast %47 : vector<1x7x56xf32> to vector<7x56xf32>
    %49 = vector.shape_cast %46 : vector<7x56xf32> to vector<1x7x56xf32>
    tpu.vector_store %arg8[%c1_41, %c1_42, %c8_43], %49 {strides = array<i32>} : memref<2x9x72xf32, #tpu.memory_space<vmem>>, vector<1x7x56xf32>,
    %cst_44 = arith.constant 0.000000e+00 : f32
    %50 = vector.broadcast %cst_44 : f32 to vector<7x112xf32>
    %c0_45 = arith.constant 0 : index
    %c0_46 = arith.constant 0 : index
    %c0_47 = arith.constant 0 : index
    %51 = vector.load %arg8[%c0_45, %c0_46, %c0_47] : memref<2x9x72xf32, #tpu.memory_space<vmem>>, vector<1x7x72xf32>
    %52 = vector.shape_cast %51 : vector<1x7x72xf32> to vector<7x72xf32>
    %53 = arith.truncf %52 : vector<7x72xf32> to vector<7x72xbf16>
    %c0_48 = arith.constant 0 : index
    %c0_49 = arith.constant 0 : index
    %c0_50 = arith.constant 0 : index
    %54 = vector.load %arg3[%c0_48, %c0_49, %c0_50] : memref<3x72x112xbf16, #tpu.memory_space<vmem>>, vector<1x72x112xbf16>
    %55 = vector.shape_cast %54 : vector<1x72x112xbf16> to vector<72x112xbf16>
    %cst_51 = arith.constant dense<0.000000e+00> : vector<7x112xf32>
    %56 = tpu.matmul %53, %55, %cst_51 {dimension_numbers = #tpu.dot_dimension_numbers<[1], [0], [0], [1], [0, 0, 1, 1], [], []>} : vector<7x72xbf16>, vector<72x112xbf16>, vector<7x112xf32> -> vector<7x112xf32>
    %57 = arith.addf %50, %56 : vector<7x112xf32>
    %c0_52 = arith.constant 0 : index
    %c1_53 = arith.constant 1 : index
    %c0_54 = arith.constant 0 : index
    %58 = vector.load %arg8[%c0_52, %c1_53, %c0_54] : memref<2x9x72xf32, #tpu.memory_space<vmem>>, vector<1x7x72xf32>
    %59 = vector.shape_cast %58 : vector<1x7x72xf32> to vector<7x72xf32>
    %60 = arith.truncf %59 : vector<7x72xf32> to vector<7x72xbf16>
    %c1_55 = arith.constant 1 : index
    %c0_56 = arith.constant 0 : index
    %c0_57 = arith.constant 0 : index
    %61 = vector.load %arg3[%c1_55, %c0_56, %c0_57] : memref<3x72x112xbf16, #tpu.memory_space<vmem>>, vector<1x72x112xbf16>
    %62 = vector.shape_cast %61 : vector<1x72x112xbf16> to vector<72x112xbf16>
    %cst_58 = arith.constant dense<0.000000e+00> : vector<7x112xf32>
    %63 = tpu.matmul %60, %62, %cst_58 {dimension_numbers = #tpu.dot_dimension_numbers<[1], [0], [0], [1], [0, 0, 1, 1], [], []>} : vector<7x72xbf16>, vector<72x112xbf16>, vector<7x112xf32> -> vector<7x112xf32>
    %64 = arith.addf %57, %63 : vector<7x112xf32>
    %c0_59 = arith.constant 0 : index
    %c2_60 = arith.constant 2 : index
    %c0_61 = arith.constant 0 : index
    %65 = vector.load %arg8[%c0_59, %c2_60, %c0_61] : memref<2x9x72xf32, #tpu.memory_space<vmem>>, vector<1x7x72xf32>
    %66 = vector.shape_cast %65 : vector<1x7x72xf32> to vector<7x72xf32>
    %67 = arith.truncf %66 : vector<7x72xf32> to vector<7x72xbf16>
    %c2_62 = arith.constant 2 : index
    %c0_63 = arith.constant 0 : index
    %c0_64 = arith.constant 0 : index
    %68 = vector.load %arg3[%c2_62, %c0_63, %c0_64] : memref<3x72x112xbf16, #tpu.memory_space<vmem>>, vector<1x72x112xbf16>
    %69 = vector.shape_cast %68 : vector<1x72x112xbf16> to vector<72x112xbf16>
    %cst_65 = arith.constant dense<0.000000e+00> : vector<7x112xf32>
    %70 = tpu.matmul %67, %69, %cst_65 {dimension_numbers = #tpu.dot_dimension_numbers<[1], [0], [0], [1], [0, 0, 1, 1], [], []>} : vector<7x72xbf16>, vector<72x112xbf16>, vector<7x112xf32> -> vector<7x112xf32>
    %71 = arith.addf %64, %70 : vector<7x112xf32>
    %72 = vector.broadcast %1 : vector<1x112xf32> to vector<7x112xf32>
    %73 = arith.addf %71, %72 : vector<7x112xf32>
    %cst_66 = arith.constant 0.000000e+00 : f32
    %74 = vector.broadcast %cst_66 : f32 to vector<7x112xf32>
    %75 = arith.maximumf %73, %74 : vector<7x112xf32>
    %cst_67 = arith.constant 0.000000e+00 : f32
    %76 = vector.broadcast %cst_67 : f32 to vector<7x112xf32>
    %c1_68 = arith.constant 1 : index
    %c0_69 = arith.constant 0 : index
    %c0_70 = arith.constant 0 : index
    %77 = vector.load %arg8[%c1_68, %c0_69, %c0_70] : memref<2x9x72xf32, #tpu.memory_space<vmem>>, vector<1x7x72xf32>
    %78 = vector.shape_cast %77 : vector<1x7x72xf32> to vector<7x72xf32>
    %79 = arith.truncf %78 : vector<7x72xf32> to vector<7x72xbf16>
    %c0_71 = arith.constant 0 : index
    %c0_72 = arith.constant 0 : index
    %c0_73 = arith.constant 0 : index
    %80 = vector.load %arg3[%c0_71, %c0_72, %c0_73] : memref<3x72x112xbf16, #tpu.memory_space<vmem>>, vector<1x72x112xbf16>
    %81 = vector.shape_cast %80 : vector<1x72x112xbf16> to vector<72x112xbf16>
    %cst_74 = arith.constant dense<0.000000e+00> : vector<7x112xf32>
    %82 = tpu.matmul %79, %81, %cst_74 {dimension_numbers = #tpu.dot_dimension_numbers<[1], [0], [0], [1], [0, 0, 1, 1], [], []>} : vector<7x72xbf16>, vector<72x112xbf16>, vector<7x112xf32> -> vector<7x112xf32>
    %83 = arith.addf %76, %82 : vector<7x112xf32>
    %c1_75 = arith.constant 1 : index
    %c1_76 = arith.constant 1 : index
    %c0_77 = arith.constant 0 : index
    %84 = vector.load %arg8[%c1_75, %c1_76, %c0_77] : memref<2x9x72xf32, #tpu.memory_space<vmem>>, vector<1x7x72xf32>
    %85 = vector.shape_cast %84 : vector<1x7x72xf32> to vector<7x72xf32>
    %86 = arith.truncf %85 : vector<7x72xf32> to vector<7x72xbf16>
    %c1_78 = arith.constant 1 : index
    %c0_79 = arith.constant 0 : index
    %c0_80 = arith.constant 0 : index
    %87 = vector.load %arg3[%c1_78, %c0_79, %c0_80] : memref<3x72x112xbf16, #tpu.memory_space<vmem>>, vector<1x72x112xbf16>
    %88 = vector.shape_cast %87 : vector<1x72x112xbf16> to vector<72x112xbf16>
    %cst_81 = arith.constant dense<0.000000e+00> : vector<7x112xf32>
    %89 = tpu.matmul %86, %88, %cst_81 {dimension_numbers = #tpu.dot_dimension_numbers<[1], [0], [0], [1], [0, 0, 1, 1], [], []>} : vector<7x72xbf16>, vector<72x112xbf16>, vector<7x112xf32> -> vector<7x112xf32>
    %90 = arith.addf %83, %89 : vector<7x112xf32>
    %c1_82 = arith.constant 1 : index
    %c2_83 = arith.constant 2 : index
    %c0_84 = arith.constant 0 : index
    %91 = vector.load %arg8[%c1_82, %c2_83, %c0_84] : memref<2x9x72xf32, #tpu.memory_space<vmem>>, vector<1x7x72xf32>
    %92 = vector.shape_cast %91 : vector<1x7x72xf32> to vector<7x72xf32>
    %93 = arith.truncf %92 : vector<7x72xf32> to vector<7x72xbf16>
    %c2_85 = arith.constant 2 : index
    %c0_86 = arith.constant 0 : index
    %c0_87 = arith.constant 0 : index
    %94 = vector.load %arg3[%c2_85, %c0_86, %c0_87] : memref<3x72x112xbf16, #tpu.memory_space<vmem>>, vector<1x72x112xbf16>
    %95 = vector.shape_cast %94 : vector<1x72x112xbf16> to vector<72x112xbf16>
    %cst_88 = arith.constant dense<0.000000e+00> : vector<7x112xf32>
    %96 = tpu.matmul %93, %95, %cst_88 {dimension_numbers = #tpu.dot_dimension_numbers<[1], [0], [0], [1], [0, 0, 1, 1], [], []>} : vector<7x72xbf16>, vector<72x112xbf16>, vector<7x112xf32> -> vector<7x112xf32>
    %97 = arith.addf %90, %96 : vector<7x112xf32>
    %98 = vector.broadcast %1 : vector<1x112xf32> to vector<7x112xf32>
    %99 = arith.addf %97, %98 : vector<7x112xf32>
    %cst_89 = arith.constant 0.000000e+00 : f32
    %100 = vector.broadcast %cst_89 : f32 to vector<7x112xf32>
    %101 = arith.maximumf %99, %100 : vector<7x112xf32>
    %cst_90 = arith.constant 0.000000e+00 : f32
    %102 = vector.broadcast %cst_90 : f32 to vector<2x32xf32>
    %103 = vector.extract_strided_slice %75 {offsets = [0, 0], sizes = [1, 112], strides = [1, 1]} : vector<7x112xf32> to vector<1x112xf32>
    %104 = vector.extract_strided_slice %101 {offsets = [0, 0], sizes = [1, 112], strides = [1, 1]} : vector<7x112xf32> to vector<1x112xf32>
    %105 = tpu.concatenate %103, %104 in 0 : vector<1x112xf32>, vector<1x112xf32> -> vector<2x112xf32>
    %106 = arith.truncf %105 : vector<2x112xf32> to vector<2x112xbf16>
    %c0_91 = arith.constant 0 : index
    %c0_92 = arith.constant 0 : index
    %c0_93 = arith.constant 0 : index
    %107 = vector.load %arg4[%c0_91, %c0_92, %c0_93] : memref<7x112x32xbf16, #tpu.memory_space<vmem>>, vector<1x112x32xbf16>
    %108 = vector.shape_cast %107 : vector<1x112x32xbf16> to vector<112x32xbf16>
    %cst_94 = arith.constant dense<0.000000e+00> : vector<2x32xf32>
    %109 = tpu.matmul %106, %108, %cst_94 {dimension_numbers = #tpu.dot_dimension_numbers<[1], [0], [0], [1], [0, 0, 1, 1], [], []>} : vector<2x112xbf16>, vector<112x32xbf16>, vector<2x32xf32> -> vector<2x32xf32>
    %110 = arith.addf %102, %109 : vector<2x32xf32>
    %111 = vector.extract_strided_slice %75 {offsets = [1, 0], sizes = [1, 112], strides = [1, 1]} : vector<7x112xf32> to vector<1x112xf32>
    %112 = vector.extract_strided_slice %101 {offsets = [1, 0], sizes = [1, 112], strides = [1, 1]} : vector<7x112xf32> to vector<1x112xf32>
    %113 = tpu.concatenate %111, %112 in 0 : vector<1x112xf32>, vector<1x112xf32> -> vector<2x112xf32>
    %114 = arith.truncf %113 : vector<2x112xf32> to vector<2x112xbf16>
    %c1_95 = arith.constant 1 : index
    %c0_96 = arith.constant 0 : index
    %c0_97 = arith.constant 0 : index
    %115 = vector.load %arg4[%c1_95, %c0_96, %c0_97] : memref<7x112x32xbf16, #tpu.memory_space<vmem>>, vector<1x112x32xbf16>
    %116 = vector.shape_cast %115 : vector<1x112x32xbf16> to vector<112x32xbf16>
    %cst_98 = arith.constant dense<0.000000e+00> : vector<2x32xf32>
    %117 = tpu.matmul %114, %116, %cst_98 {dimension_numbers = #tpu.dot_dimension_numbers<[1], [0], [0], [1], [0, 0, 1, 1], [], []>} : vector<2x112xbf16>, vector<112x32xbf16>, vector<2x32xf32> -> vector<2x32xf32>
    %118 = arith.addf %110, %117 : vector<2x32xf32>
    %119 = vector.extract_strided_slice %75 {offsets = [2, 0], sizes = [1, 112], strides = [1, 1]} : vector<7x112xf32> to vector<1x112xf32>
    %120 = vector.extract_strided_slice %101 {offsets = [2, 0], sizes = [1, 112], strides = [1, 1]} : vector<7x112xf32> to vector<1x112xf32>
    %121 = tpu.concatenate %119, %120 in 0 : vector<1x112xf32>, vector<1x112xf32> -> vector<2x112xf32>
    %122 = arith.truncf %121 : vector<2x112xf32> to vector<2x112xbf16>
    %c2_99 = arith.constant 2 : index
    %c0_100 = arith.constant 0 : index
    %c0_101 = arith.constant 0 : index
    %123 = vector.load %arg4[%c2_99, %c0_100, %c0_101] : memref<7x112x32xbf16, #tpu.memory_space<vmem>>, vector<1x112x32xbf16>
    %124 = vector.shape_cast %123 : vector<1x112x32xbf16> to vector<112x32xbf16>
    %cst_102 = arith.constant dense<0.000000e+00> : vector<2x32xf32>
    %125 = tpu.matmul %122, %124, %cst_102 {dimension_numbers = #tpu.dot_dimension_numbers<[1], [0], [0], [1], [0, 0, 1, 1], [], []>} : vector<2x112xbf16>, vector<112x32xbf16>, vector<2x32xf32> -> vector<2x32xf32>
    %126 = arith.addf %118, %125 : vector<2x32xf32>
    %127 = vector.extract_strided_slice %75 {offsets = [3, 0], sizes = [1, 112], strides = [1, 1]} : vector<7x112xf32> to vector<1x112xf32>
    %128 = vector.extract_strided_slice %101 {offsets = [3, 0], sizes = [1, 112], strides = [1, 1]} : vector<7x112xf32> to vector<1x112xf32>
    %129 = tpu.concatenate %127, %128 in 0 : vector<1x112xf32>, vector<1x112xf32> -> vector<2x112xf32>
    %130 = arith.truncf %129 : vector<2x112xf32> to vector<2x112xbf16>
    %c3_103 = arith.constant 3 : index
    %c0_104 = arith.constant 0 : index
    %c0_105 = arith.constant 0 : index
    %131 = vector.load %arg4[%c3_103, %c0_104, %c0_105] : memref<7x112x32xbf16, #tpu.memory_space<vmem>>, vector<1x112x32xbf16>
    %132 = vector.shape_cast %131 : vector<1x112x32xbf16> to vector<112x32xbf16>
    %cst_106 = arith.constant dense<0.000000e+00> : vector<2x32xf32>
    %133 = tpu.matmul %130, %132, %cst_106 {dimension_numbers = #tpu.dot_dimension_numbers<[1], [0], [0], [1], [0, 0, 1, 1], [], []>} : vector<2x112xbf16>, vector<112x32xbf16>, vector<2x32xf32> -> vector<2x32xf32>
    %134 = arith.addf %126, %133 : vector<2x32xf32>
    %135 = vector.extract_strided_slice %75 {offsets = [4, 0], sizes = [1, 112], strides = [1, 1]} : vector<7x112xf32> to vector<1x112xf32>
    %136 = vector.extract_strided_slice %101 {offsets = [4, 0], sizes = [1, 112], strides = [1, 1]} : vector<7x112xf32> to vector<1x112xf32>
    %137 = tpu.concatenate %135, %136 in 0 : vector<1x112xf32>, vector<1x112xf32> -> vector<2x112xf32>
    %138 = arith.truncf %137 : vector<2x112xf32> to vector<2x112xbf16>
    %c4 = arith.constant 4 : index
    %c0_107 = arith.constant 0 : index
    %c0_108 = arith.constant 0 : index
    %139 = vector.load %arg4[%c4, %c0_107, %c0_108] : memref<7x112x32xbf16, #tpu.memory_space<vmem>>, vector<1x112x32xbf16>
    %140 = vector.shape_cast %139 : vector<1x112x32xbf16> to vector<112x32xbf16>
    %cst_109 = arith.constant dense<0.000000e+00> : vector<2x32xf32>
    %141 = tpu.matmul %138, %140, %cst_109 {dimension_numbers = #tpu.dot_dimension_numbers<[1], [0], [0], [1], [0, 0, 1, 1], [], []>} : vector<2x112xbf16>, vector<112x32xbf16>, vector<2x32xf32> -> vector<2x32xf32>
    %142 = arith.addf %134, %141 : vector<2x32xf32>
    %143 = vector.extract_strided_slice %75 {offsets = [5, 0], sizes = [1, 112], strides = [1, 1]} : vector<7x112xf32> to vector<1x112xf32>
    %144 = vector.extract_strided_slice %101 {offsets = [5, 0], sizes = [1, 112], strides = [1, 1]} : vector<7x112xf32> to vector<1x112xf32>
    %145 = tpu.concatenate %143, %144 in 0 : vector<1x112xf32>, vector<1x112xf32> -> vector<2x112xf32>
    %146 = arith.truncf %145 : vector<2x112xf32> to vector<2x112xbf16>
    %c5 = arith.constant 5 : index
    %c0_110 = arith.constant 0 : index
    %c0_111 = arith.constant 0 : index
    %147 = vector.load %arg4[%c5, %c0_110, %c0_111] : memref<7x112x32xbf16, #tpu.memory_space<vmem>>, vector<1x112x32xbf16>
    %148 = vector.shape_cast %147 : vector<1x112x32xbf16> to vector<112x32xbf16>
    %cst_112 = arith.constant dense<0.000000e+00> : vector<2x32xf32>
    %149 = tpu.matmul %146, %148, %cst_112 {dimension_numbers = #tpu.dot_dimension_numbers<[1], [0], [0], [1], [0, 0, 1, 1], [], []>} : vector<2x112xbf16>, vector<112x32xbf16>, vector<2x32xf32> -> vector<2x32xf32>
    %150 = arith.addf %142, %149 : vector<2x32xf32>
    %151 = vector.extract_strided_slice %75 {offsets = [6, 0], sizes = [1, 112], strides = [1, 1]} : vector<7x112xf32> to vector<1x112xf32>
    %152 = vector.extract_strided_slice %101 {offsets = [6, 0], sizes = [1, 112], strides = [1, 1]} : vector<7x112xf32> to vector<1x112xf32>
    %153 = tpu.concatenate %151, %152 in 0 : vector<1x112xf32>, vector<1x112xf32> -> vector<2x112xf32>
    %154 = arith.truncf %153 : vector<2x112xf32> to vector<2x112xbf16>
    %c6 = arith.constant 6 : index
    %c0_113 = arith.constant 0 : index
    %c0_114 = arith.constant 0 : index
    %155 = vector.load %arg4[%c6, %c0_113, %c0_114] : memref<7x112x32xbf16, #tpu.memory_space<vmem>>, vector<1x112x32xbf16>
    %156 = vector.shape_cast %155 : vector<1x112x32xbf16> to vector<112x32xbf16>
    %cst_115 = arith.constant dense<0.000000e+00> : vector<2x32xf32>
    %157 = tpu.matmul %154, %156, %cst_115 {dimension_numbers = #tpu.dot_dimension_numbers<[1], [0], [0], [1], [0, 0, 1, 1], [], []>} : vector<2x112xbf16>, vector<112x32xbf16>, vector<2x32xf32> -> vector<2x32xf32>
    %158 = arith.addf %150, %157 : vector<2x32xf32>
    %159 = vector.broadcast %2 : vector<1x32xf32> to vector<2x32xf32>
    %160 = arith.addf %158, %159 : vector<2x32xf32>
    %cst_116 = arith.constant 0.000000e+00 : f32
    %161 = vector.broadcast %cst_116 : f32 to vector<2x32xf32>
    %162 = arith.maximumf %160, %161 : vector<2x32xf32>
    %163 = arith.truncf %162 : vector<2x32xf32> to vector<2x32xbf16>
    %c0_117 = arith.constant 0 : index
    %c0_118 = arith.constant 0 : index
    %164 = vector.load %arg5[%c0_117, %c0_118] : memref<32x36xbf16, #tpu.memory_space<vmem>>, vector<32x36xbf16>
    %cst_119 = arith.constant dense<0.000000e+00> : vector<2x36xf32>
    %165 = tpu.matmul %163, %164, %cst_119 {dimension_numbers = #tpu.dot_dimension_numbers<[1], [0], [0], [1], [0, 0, 1, 1], [], []>} : vector<2x32xbf16>, vector<32x36xbf16>, vector<2x36xf32> -> vector<2x36xf32>
    %166 = vector.broadcast %3 : vector<1x36xf32> to vector<2x36xf32>
    %167 = arith.addf %165, %166 : vector<2x36xf32>
    %168 = vector.extract_strided_slice %167 {offsets = [0, 0], sizes = [2, 6], strides = [1, 1]} : vector<2x36xf32> to vector<2x6xf32>
    %cst_120 = arith.constant dense<0xFF800000> : vector<2xf32>
    %169 = vector.multi_reduction <maximumf>, %168, %cst_120 [1] : vector<2x6xf32> to vector<2xf32>
    %170 = vector.shape_cast %169 : vector<2xf32> to vector<2x1xf32>
    %171 = vector.broadcast %170 : vector<2x1xf32> to vector<2x6xf32>
    %172 = arith.subf %168, %171 : vector<2x6xf32>
    %173 = math.exp %172 : vector<2x6xf32>
    %cst_121 = arith.constant dense<0.000000e+00> : vector<2xf32>
    %174 = vector.multi_reduction <add>, %173, %cst_121 [1] : vector<2x6xf32> to vector<2xf32>
    %175 = vector.shape_cast %174 : vector<2xf32> to vector<2x1xf32>
    %176 = vector.broadcast %175 : vector<2x1xf32> to vector<2x6xf32>
    %177 = arith.divf %173, %176 : vector<2x6xf32>
    %c0_122 = arith.constant 0 : index
    %c0_123 = arith.constant 0 : index
    %178 = vector.load %arg7[%c0_122, %c0_123] : memref<2x36xf32, #tpu.memory_space<vmem>>, vector<2x6xf32>
    tpu.vector_store %arg7[%c0_122, %c0_123], %177 {strides = array<i32>} : memref<2x36xf32, #tpu.memory_space<vmem>>, vector<2x6xf32>,
    %179 = vector.extract_strided_slice %167 {offsets = [0, 6], sizes = [2, 6], strides = [1, 1]} : vector<2x36xf32> to vector<2x6xf32>
    %cst_124 = arith.constant dense<0xFF800000> : vector<2xf32>
    %180 = vector.multi_reduction <maximumf>, %179, %cst_124 [1] : vector<2x6xf32> to vector<2xf32>
    %181 = vector.shape_cast %180 : vector<2xf32> to vector<2x1xf32>
    %182 = vector.broadcast %181 : vector<2x1xf32> to vector<2x6xf32>
    %183 = arith.subf %179, %182 : vector<2x6xf32>
    %184 = math.exp %183 : vector<2x6xf32>
    %cst_125 = arith.constant dense<0.000000e+00> : vector<2xf32>
    %185 = vector.multi_reduction <add>, %184, %cst_125 [1] : vector<2x6xf32> to vector<2xf32>
    %186 = vector.shape_cast %185 : vector<2xf32> to vector<2x1xf32>
    %187 = vector.broadcast %186 : vector<2x1xf32> to vector<2x6xf32>
    %188 = arith.divf %184, %187 : vector<2x6xf32>
    %c0_126 = arith.constant 0 : index
    %c6_127 = arith.constant 6 : index
    %189 = vector.load %arg7[%c0_126, %c6_127] : memref<2x36xf32, #tpu.memory_space<vmem>>, vector<2x6xf32>
    tpu.vector_store %arg7[%c0_126, %c6_127], %188 {strides = array<i32>} : memref<2x36xf32, #tpu.memory_space<vmem>>, vector<2x6xf32>,
    %190 = vector.extract_strided_slice %167 {offsets = [0, 12], sizes = [2, 6], strides = [1, 1]} : vector<2x36xf32> to vector<2x6xf32>
    %cst_128 = arith.constant dense<0xFF800000> : vector<2xf32>
    %191 = vector.multi_reduction <maximumf>, %190, %cst_128 [1] : vector<2x6xf32> to vector<2xf32>
    %192 = vector.shape_cast %191 : vector<2xf32> to vector<2x1xf32>
    %193 = vector.broadcast %192 : vector<2x1xf32> to vector<2x6xf32>
    %194 = arith.subf %190, %193 : vector<2x6xf32>
    %195 = math.exp %194 : vector<2x6xf32>
    %cst_129 = arith.constant dense<0.000000e+00> : vector<2xf32>
    %196 = vector.multi_reduction <add>, %195, %cst_129 [1] : vector<2x6xf32> to vector<2xf32>
    %197 = vector.shape_cast %196 : vector<2xf32> to vector<2x1xf32>
    %198 = vector.broadcast %197 : vector<2x1xf32> to vector<2x6xf32>
    %199 = arith.divf %195, %198 : vector<2x6xf32>
    %c0_130 = arith.constant 0 : index
    %c12 = arith.constant 12 : index
    %200 = vector.load %arg7[%c0_130, %c12] : memref<2x36xf32, #tpu.memory_space<vmem>>, vector<2x6xf32>
    tpu.vector_store %arg7[%c0_130, %c12], %199 {strides = array<i32>} : memref<2x36xf32, #tpu.memory_space<vmem>>, vector<2x6xf32>,
    %201 = vector.extract_strided_slice %167 {offsets = [0, 18], sizes = [2, 6], strides = [1, 1]} : vector<2x36xf32> to vector<2x6xf32>
    %cst_131 = arith.constant dense<0xFF800000> : vector<2xf32>
    %202 = vector.multi_reduction <maximumf>, %201, %cst_131 [1] : vector<2x6xf32> to vector<2xf32>
    %203 = vector.shape_cast %202 : vector<2xf32> to vector<2x1xf32>
    %204 = vector.broadcast %203 : vector<2x1xf32> to vector<2x6xf32>
    %205 = arith.subf %201, %204 : vector<2x6xf32>
    %206 = math.exp %205 : vector<2x6xf32>
    %cst_132 = arith.constant dense<0.000000e+00> : vector<2xf32>
    %207 = vector.multi_reduction <add>, %206, %cst_132 [1] : vector<2x6xf32> to vector<2xf32>
    %208 = vector.shape_cast %207 : vector<2xf32> to vector<2x1xf32>
    %209 = vector.broadcast %208 : vector<2x1xf32> to vector<2x6xf32>
    %210 = arith.divf %206, %209 : vector<2x6xf32>
    %c0_133 = arith.constant 0 : index
    %c18 = arith.constant 18 : index
    %211 = vector.load %arg7[%c0_133, %c18] : memref<2x36xf32, #tpu.memory_space<vmem>>, vector<2x6xf32>
    tpu.vector_store %arg7[%c0_133, %c18], %210 {strides = array<i32>} : memref<2x36xf32, #tpu.memory_space<vmem>>, vector<2x6xf32>,
    %212 = vector.extract_strided_slice %167 {offsets = [0, 24], sizes = [2, 4], strides = [1, 1]} : vector<2x36xf32> to vector<2x4xf32>
    %c0_134 = arith.constant 0 : index
    %c24 = arith.constant 24 : index
    %213 = vector.load %arg7[%c0_134, %c24] : memref<2x36xf32, #tpu.memory_space<vmem>>, vector<2x4xf32>
    tpu.vector_store %arg7[%c0_134, %c24], %212 {strides = array<i32>} : memref<2x36xf32, #tpu.memory_space<vmem>>, vector<2x4xf32>,
    %214 = vector.extract_strided_slice %167 {offsets = [0, 28], sizes = [2, 4], strides = [1, 1]} : vector<2x36xf32> to vector<2x4xf32>
    %cst_135 = arith.constant 0.000000e+00 : f32
    %215 = vector.broadcast %cst_135 : f32 to vector<2x4xf32>
    %216 = arith.subf %215, %214 : vector<2x4xf32>
    %217 = math.exp %216 : vector<2x4xf32>
    %cst_136 = arith.constant 1.000000e+00 : f32
    %218 = vector.broadcast %cst_136 : f32 to vector<2x4xf32>
    %219 = arith.addf %218, %217 : vector<2x4xf32>
    %cst_137 = arith.constant 1.000000e+00 : f32
    %220 = vector.broadcast %cst_137 : f32 to vector<2x4xf32>
    %221 = arith.divf %220, %219 : vector<2x4xf32>
    %c0_138 = arith.constant 0 : index
    %c28 = arith.constant 28 : index
    %222 = vector.load %arg7[%c0_138, %c28] : memref<2x36xf32, #tpu.memory_space<vmem>>, vector<2x4xf32>
    tpu.vector_store %arg7[%c0_138, %c28], %221 {strides = array<i32>} : memref<2x36xf32, #tpu.memory_space<vmem>>, vector<2x4xf32>,
    %223 = vector.extract_strided_slice %167 {offsets = [0, 32], sizes = [2, 4], strides = [1, 1]} : vector<2x36xf32> to vector<2x4xf32>
    %cst_139 = arith.constant dense<0xFF800000> : vector<2xf32>
    %224 = vector.multi_reduction <maximumf>, %223, %cst_139 [1] : vector<2x4xf32> to vector<2xf32>
    %225 = vector.shape_cast %224 : vector<2xf32> to vector<2x1xf32>
    %226 = vector.broadcast %225 : vector<2x1xf32> to vector<2x4xf32>
    %227 = arith.subf %223, %226 : vector<2x4xf32>
    %228 = math.exp %227 : vector<2x4xf32>
    %cst_140 = arith.constant dense<0.000000e+00> : vector<2xf32>
    %229 = vector.multi_reduction <add>, %228, %cst_140 [1] : vector<2x4xf32> to vector<2xf32>
    %230 = vector.shape_cast %229 : vector<2xf32> to vector<2x1xf32>
    %231 = vector.broadcast %230 : vector<2x1xf32> to vector<2x4xf32>
    %232 = arith.divf %228, %231 : vector<2x4xf32>
    %c0_141 = arith.constant 0 : index
    %c32 = arith.constant 32 : index
    %233 = vector.load %arg7[%c0_141, %c32] : memref<2x36xf32, #tpu.memory_space<vmem>>, vector<2x4xf32>
    tpu.vector_store %arg7[%c0_141, %c32], %232 {strides = array<i32>} : memref<2x36xf32, #tpu.memory_space<vmem>>, vector<2x4xf32>,
    return
  }
  func.func @transform_0(%arg0: i32) -> (i32, i32, i32) {
    %c0_i32 = arith.constant 0 : i32
    %c0_i32_0 = arith.constant 0 : i32
    %c0_i32_1 = arith.constant 0 : i32
    %c0_i32_2 = arith.constant 0 : i32
    return %c0_i32, %c0_i32_0, %c0_i32_1 : i32, i32, i32
  }
  func.func @transform_1(%arg0: i32) -> (i32, i32, i32) {
    %c0_i32 = arith.constant 0 : i32
    %c0_i32_0 = arith.constant 0 : i32
    %c0_i32_1 = arith.constant 0 : i32
    %c0_i32_2 = arith.constant 0 : i32
    return %c0_i32, %c0_i32_0, %c0_i32_1 : i32, i32, i32
  }
  func.func @transform_2(%arg0: i32) -> (i32, i32, i32) {
    %c0_i32 = arith.constant 0 : i32
    %c0_i32_0 = arith.constant 0 : i32
    %c0_i32_1 = arith.constant 0 : i32
    %c0_i32_2 = arith.constant 0 : i32
    return %c0_i32, %c0_i32_0, %c0_i32_1 : i32, i32, i32
  }
  func.func @transform_3(%arg0: i32) -> (i32, i32, i32) {
    %c0_i32 = arith.constant 0 : i32
    %c0_i32_0 = arith.constant 0 : i32
    %c0_i32_1 = arith.constant 0 : i32
    %c0_i32_2 = arith.constant 0 : i32
    return %c0_i32, %c0_i32_0, %c0_i32_1 : i32, i32, i32
  }
  func.func @transform_4(%arg0: i32) -> (i32, i32) {
    %c0_i32 = arith.constant 0 : i32
    %c0_i32_0 = arith.constant 0 : i32
    %c0_i32_1 = arith.constant 0 : i32
    return %c0_i32, %c0_i32_0 : i32, i32
  }
  func.func @transform_5(%arg0: i32) -> (i32, i32) {
    %c0_i32 = arith.constant 0 : i32
    %c0_i32_0 = arith.constant 0 : i32
    %c0_i32_1 = arith.constant 0 : i32
    return %c0_i32, %c0_i32_0 : i32, i32
  }
  func.func @transform_6(%arg0: i32) -> (i32, i32) {
    %c0_i32 = arith.constant 0 : i32
    %c0_i32_0 = arith.constant 0 : i32
    %c0_i32_1 = arith.constant 0 : i32
    return %c0_i32, %c0_i32_0 : i32, i32
  }
}

</mosaic_0001>

<bundles_post_ra>
// kernel: miniworld_oc_ff_forward.1
= control target key start
LH: loop header
LB: loop body
LE: loop exit
PB: predicated region body
PF: predicated region fallthrough
CT: control target
= control target key end

     0   :  { %vm28_vm0 = vcmask 588800   ;;  %vm422_vm1 = vcmask 1043456   ;;  %v2032_v46 = vmov 0.0   ;;  %vm30_vm2 = vcmask 581632   ;;  %s2033_s15 = smov 8   ;;  %s2035_s24 = smov 96   ;;  %s2519_s1 = inlined_call_operand.vmem [shape: bf16[2,128,56], index: 1, kind: input, shape index: {}]   ;;  %s2520_s0 = inlined_call_operand.vmem [shape: f32[2,8,128], index: 0, kind: input, shape index: {}]   ;;  %s2521_s5 = inlined_call_operand.vmem [shape: f32[4,128], index: 5, kind: input, shape index: {}]   ;;  %s2522_s2 = inlined_call_operand.vmem [shape: bf16[3,72,112], index: 2, kind: input, shape index: {}]   ;;  %s2523_s3 = inlined_call_operand.vmem [shape: bf16[7,112,32], index: 3, kind: input, shape index: {}]   ;;  %s2524_s4 = inlined_call_operand.vmem [shape: bf16[32,36], index: 4, kind: input, shape index: {}]   ;;  %s2525_s6 = inlined_call_operand.vmem [shape: f32[2,36], index: 6, kind: output, shape index: {}]  }
   0x1   :  { %v1918_v0 = vld [vmem:[%s2519_s1 + $0x78] sm:$0xff]  ;;  %v1917_v4 = vld [vmem:[%s2519_s1 + $0x70] sm:$0xff]  ;;  %v1916_v8 = vld [vmem:[%s2519_s1 + $0x68] sm:$0xff]  ;;  %29 = vst.msk [vmem:[#allocation2] sm:$0xff] %vm28_vm0, %v2032_v46  ;;  %vm200_vm3 = vcmask 522304   ;;  %vm607_vm4 = vcmask 1040384  }
   0x2   :  { %v1910_v1 = vld [vmem:[%s2519_s1 + $0x38] sm:$0xff]  ;;  %119 = vmatpush.bf16.msra.mxu0 %v1918_v0  ;;  %v1909_v5 = vld [vmem:[%s2519_s1 + $0x30] sm:$0xff]  ;;  %v1908_v9 = vld [vmem:[%s2519_s1 + $0x28] sm:$0xff]  ;;  %31 = vst.msk [vmem:[#allocation2 + $0x8] sm:$0x1] %vm30_vm2, %v2032_v46  ;;  %vm686_vm5 = vcmask 916480  }
   0x3   :  { %v1934_v2 = vld [vmem:[%s2519_s1 + $0x78] sm:$0xff]  ;;  %180 = vmatpush.bf16.msra.mxu1 %v1910_v1  ;;  %v1933_v6 = vld [vmem:[%s2519_s1 + $0x70] sm:$0xff]  ;;  %v1932_v10 = vld [vmem:[%s2519_s1 + $0x68] sm:$0xff]  ;;  %33 = vst.msk [vmem:[#allocation2 + $0x18] sm:$0x1] %vm30_vm2, %v2032_v46  ;;  %vm1182_vm6 = vcmask 261120  }
   0x4   :  { %v1926_v3 = vld [vmem:[%s2519_s1 + $0x38] sm:$0xff]  ;;  %287 = vmatpush.bf16.msra.mxu2 %v1934_v2  ;;  %v1925_v7 = vld [vmem:[%s2519_s1 + $0x30] sm:$0xff]  ;;  %v1924_v11 = vld [vmem:[%s2519_s1 + $0x28] sm:$0xff]  ;;  %32 = vst.msk [vmem:[#allocation2 + $0x10] sm:$0xff] %vm28_vm0, %v2032_v46  ;;  %vm1285_vm7 = vcmask 189584   ;;  %vm1225_vm8 = vcmask 91184  }
   0x5   :  { %348 = vmatpush.bf16.msra.mxu3 %v1926_v3  ;;  %v1915_v12 = vld [vmem:[%s2519_s1 + $0x60] sm:$0xff]  ;;  %v1914_v16 = vld [vmem:[%s2519_s1 + $0x58] sm:$0xff]  ;;  %v1913_v20 = vld [vmem:[%s2519_s1 + $0x50] sm:$0xff]  ;;  %vm1199_vm9 = vcmask 41984   ;;  %vm1338_vm10 = vcmask 288000   ;;  %vm1255_vm11 = vcmask 140384  }
   0x6   :  { %120 = vmatpush.bf16.msra.mxu0 %v1917_v4  ;;  %v1907_v13 = vld [vmem:[%s2519_s1 + $0x20] sm:$0xff]  ;;  %v1906_v17 = vld [vmem:[%s2519_s1 + $0x18] sm:$0xff]  ;;  %v1905_v21 = vld [vmem:[%s2519_s1 + $0x10] sm:$0xff]  ;;  %s2036_s25 = smov 116   ;;  %s2037_s26 = smov 110   ;;  %vm1349_vm12 = vcmask 25600  }
   0x7   :  { %181 = vmatpush.bf16.msra.mxu1 %v1909_v5  ;;  %v1931_v14 = vld [vmem:[%s2519_s1 + $0x60] sm:$0xff]  ;;  %v1930_v18 = vld [vmem:[%s2519_s1 + $0x58] sm:$0xff]  ;;  %v1929_v22 = vld [vmem:[%s2519_s1 + $0x50] sm:$0xff] }
   0x8   :  { %288 = vmatpush.bf16.msra.mxu2 %v1933_v6  ;;  %v1923_v15 = vld [vmem:[%s2519_s1 + $0x20] sm:$0xff]  ;;  %v1922_v19 = vld [vmem:[%s2519_s1 + $0x18] sm:$0xff]  ;;  %v1921_v23 = vld [vmem:[%s2519_s1 + $0x10] sm:$0xff] }
   0x9   :  { %349 = vmatpush.bf16.msra.mxu3 %v1925_v7  ;;  %v1912_v24 = vld [vmem:[%s2519_s1 + $0x48] sm:$0xff]  ;;  %v1911_v28 = vld [vmem:[%s2519_s1 + $0x40] sm:$0xff]  ;;  %v1938_v54 = vld [vmem:[%s2522_s2 + $0x18] sm:$0xff] }
   0xa   :  { %121 = vmatpush.bf16.msra.mxu0 %v1916_v8  ;;  %v1904_v25 = vld [vmem:[%s2519_s1 + $0x8] sm:$0xff]  ;;  %v1903_v29 = vld [vmem:[%s2519_s1] sm:$0xff]  ;;  %v1941_v56 = vld [vmem:[%s2522_s2 + $0x34] sm:$0xff] }
   0xb   :  { %182 = vmatpush.bf16.msra.mxu1 %v1908_v9  ;;  %v1928_v26 = vld [vmem:[%s2519_s1 + $0x48] sm:$0xff]  ;;  %v1927_v30 = vld [vmem:[%s2519_s1 + $0x40] sm:$0xff]  ;;  %v1937_v57 = vld [vmem:[%s2522_s2 + $0x10] sm:$0xff] }
   0xc   :  { %289 = vmatpush.bf16.msra.mxu2 %v1932_v10  ;;  %v1920_v27 = vld [vmem:[%s2519_s1 + $0x8] sm:$0xff]  ;;  %v52_v31 = vld [vmem:[%s2520_s0 + $0x1] sm:$0x7f]  ;;  %v1945_v58 = vld [vmem:[%s2522_s2 + $0x58] sm:$0xff] }
   0xd   :  { %350 = vmatpush.bf16.msra.mxu3 %v1924_v11  ;;  %v34_v32 = vld [vmem:[%s2520_s0] sm:$0x7f]  ;;  %v1454_v34 = vld [vmem:[%s2520_s0 + $0x9] sm:$0x7f]  ;;  %v53_v36 = vpack.c.bf16 %v52_v31, %v52_v31 }
   0xe   :  { %122 = vmatpush.bf16.msra.mxu0 %v1915_v12  ;;  %v1919_v33 = vld [vmem:[%s2519_s1] sm:$0xff]  ;;  %v1453_v35 = vld [vmem:[%s2520_s0 + $0x8] sm:$0x7f]  ;;  %v35_v37 = vpack.c.bf16 %v34_v32, %v34_v32  ;;  %v222_v38 = vpack.c.bf16 %v1454_v34, %v1454_v34  ;;  %v1944_v12 = vld [vmem:[%s2522_s2 + $0x50] sm:$0xff] }
   0xf   :  { %183 = vmatpush.bf16.msra.mxu1 %v1907_v13  ;;  %v204_v39 = vpack.c.bf16 %v1453_v35, %v1453_v35  ;;  %v1543_v40 = vld [vmem:[%s2522_s2 + $0x44] sm:$0xf]  ;;  %v379_v41 = vld [vmem:[%s2522_s2 + $0x20] sm:$0xf]  ;;  %v1586_v44 = vld [vmem:[%s2522_s2 + $0x68] sm:$0xf] }
  0x10   :  { %290 = vmatpush.bf16.msra.mxu2 %v1931_v14  ;;  %v409_v42 = vunpack.c.l.b16 %v1543_v40  ;;  %v456_v43 = vunpack.c.l.b16 %v379_v41  ;;  %v514_v45 = vunpack.c.l.b16 %v1586_v44  ;;  %v1942_v53 = vld [vmem:[%s2522_s2 + $0x3c] sm:$0xff]  ;;  %v1940_v10 = vld [vmem:[%s2522_s2 + $0x2c] sm:$0xff]  ;;  %v1939_v13 = vld [vmem:[%s2522_s2 + $0x24] sm:$0xff] }
  0x11   :  { %351 = vmatpush.bf16.msra.mxu3 %v1923_v15  ;;  %v1946_v55 = vld [vmem:[%s2522_s2 + $0x60] sm:$0xff]  ;;  %v1936_v11 = vld [vmem:[%s2522_s2 + $0x8] sm:$0xff]  ;;  %v1957_v40 = vld [vmem:[%s2523_s3 + $0x50] sm:$0xff] }
  0x12   :  { %123 = vmatpush.bf16.msra.mxu0 %v1914_v16  ;;  %v414_v47 = vpack.c.b16 %v409_v42, %v409_v42  ;;  %v461_v48 = vpack.c.b16 %v456_v43, %v456_v43  ;;  %v519_v49 = vpack.c.b16 %v514_v45, %v514_v45  ;;  %v2004_v59 = vld [vmem:[%s2521_s5] ss:$0 sm:$0xff]  ;;  %v1943_v15 = vld [vmem:[%s2522_s2 + $0x48] sm:$0xff]  ;;  %v1950_v41 = vld [vmem:[%s2523_s3 + $0x18] sm:$0xff] }
  0x13   :  { %184 = vmatpush.bf16.msra.mxu1 %v1906_v17  ;;  %v1935_v14 = vld [vmem:[%s2522_s2] sm:$0xff]  ;;  %v1960_v16 = vld [vmem:[%s2523_s3 + $0x68] sm:$0xff]  ;;  %v1953_v17 = vld [vmem:[%s2523_s3 + $0x30] sm:$0xff] }
  0x14   :  { %291 = vmatpush.bf16.msra.mxu2 %v1930_v18  ;;  %v424_v50 = vsel %vm422_vm1, %v414_v47, 0  ;;  %v470_v51 = vsel %vm422_vm1, %v461_v48, 0  ;;  %v528_v52 = vsel %vm422_vm1, %v519_v49, 0  ;;  %v1959_v18 = vld [vmem:[%s2523_s3 + $0x60] sm:$0xff]  ;;  %v1964_v42 = vld [vmem:[%s2523_s3 + $0x88] sm:$0xff]  ;;  %v1973_v43 = vld [vmem:[%s2523_s3 + $0xd0] sm:$0xff] }
  0x15   :  { %352 = vmatpush.bf16.msra.mxu3 %v1922_v19  ;;  %v1952_v19 = vld [vmem:[%s2523_s3 + $0x28] sm:$0xff]  ;;  %v1949_v45 = vld [vmem:[%s2523_s3 + $0x10] sm:$0xff]  ;;  %v1963_v46 = vld [vmem:[%s2523_s3 + $0x80] sm:$0xff] }
  0x16   :  { %124 = vmatpush.bf16.msra.mxu0 %v1913_v20  ;;  %v1956_v44 = vld [vmem:[%s2523_s3 + $0x48] sm:$0xff]  ;;  %v1955_v48 = vld [vmem:[%s2523_s3 + $0x40] sm:$0xff] }
  0x17   :  { %185 = vmatpush.bf16.msra.mxu1 %v1905_v21  ;;  %v1967_v21 = vld [vmem:[%s2523_s3 + $0xa0] sm:$0xff]  ;;  %v1972_v47 = vld [vmem:[%s2523_s3 + $0xc8] sm:$0xff] }
  0x18   :  { %292 = vmatpush.bf16.msra.mxu2 %v1929_v22  ;;  %v1948_v49 = vld [vmem:[%s2523_s3 + $0x8] sm:$0xff] }
  0x19   :  { %353 = vmatpush.bf16.msra.mxu3 %v1921_v23 }
  0x1a   :  { %125 = vmatpush.bf16.msra.mxu0 %v1912_v24 }
  0x1b   :  { %186 = vmatpush.bf16.msra.mxu1 %v1904_v25 }
  0x1c   :  { %293 = vmatpush.bf16.msra.mxu2 %v1928_v26 }
  0x1d   :  { %354 = vmatpush.bf16.msra.mxu3 %v1920_v27 }
  0x1e   :  { %126 = vmatpush.bf16.msra.mxu0 %v1911_v28 }
  0x1f   :  { %187 = vmatpush.bf16.msra.mxu1 %v1903_v29  ;;  %v1966_v29 = vld [vmem:[%s2523_s3 + $0x98] sm:$0xff] }
  0x20   :  { %294 = vmatpush.bf16.msra.mxu2 %v1927_v30 }
  0x21   :  { %355 = vmatpush.bf16.msra.mxu3 %v1919_v33  ;;  %127 = vmatmul.bf16.vlgmr.msra.gmra.mxu0 %v53_v36  ;;  %v1958_v36 = vld [vmem:[%s2523_s3 + $0x58] sm:$0xff] }
  0x22   :  { %188 = vmatmul.bf16.vlgmr.msra.gmra.mxu1 %v35_v37  ;;  %429 = vmatpush.bf16.msrb.mxu0 %v424_v50  ;;  %v1951_v37 = vld [vmem:[%s2523_s3 + $0x20] sm:$0xff] }
  0x23   :  { %295 = vmatmul.bf16.vlgmr.msra.gmra.mxu2 %v222_v38  ;;  %475 = vmatpush.bf16.msrb.mxu1 %v470_v51  ;;  %v1965_v38 = vld [vmem:[%s2523_s3 + $0x90] sm:$0xff] }
  0x24   :  { %356 = vmatmul.bf16.vlgmr.msra.gmra.mxu3 %v204_v39  ;;  %533 = vmatpush.bf16.msrb.mxu2 %v528_v52  ;;  %v1974_v39 = vld [vmem:[%s2523_s3 + $0xd8] sm:$0xff] }
  0x25   :  { %557 = vmatpush.bf16.msrb.mxu3 %v424_v50  ;;  %v1962_v50 = vld [vmem:[%s2523_s3 + $0x78] sm:$0xff] }
  0x26   :  { %430 = vmatpush.bf16.msrb.mxu0 %v1942_v53 }
  0x27   :  { %476 = vmatpush.bf16.msrb.mxu1 %v1938_v54 }
  0x28   :  { %534 = vmatpush.bf16.msrb.mxu2 %v1946_v55 }
  0x29   :  { %558 = vmatpush.bf16.msrb.mxu3 %v1942_v53  ;;  %v1981_v53 = vld [vmem:[%s2523_s3 + $0x110] sm:$0xff] }
  0x2a   :  { %431 = vmatpush.bf16.msrb.mxu0 %v1941_v56 }
  0x2b   :  { %477 = vmatpush.bf16.msrb.mxu1 %v1937_v57 }
  0x2c   :  { %535 = vmatpush.bf16.msrb.mxu2 %v1945_v58 }
  0x2d   :  { %559 = vmatpush.bf16.msrb.mxu3 %v1941_v56  ;;  %v1970_v56 = vld [vmem:[%s2523_s3 + $0xb8] sm:$0xff] }
  0x2e   :  { %432 = vmatpush.bf16.msrb.mxu0 %v1940_v10 }
  0x2f   :  { %478 = vmatpush.bf16.msrb.mxu1 %v1936_v11 }
  0x30   :  { %536 = vmatpush.bf16.msrb.mxu2 %v1944_v12 }
  0x31   :  { %560 = vmatpush.bf16.msrb.mxu3 %v1940_v10  ;;  %v1991_v10 = vld [vmem:[%s2523_s3 + $0x160] sm:$0xff] }
  0x32   :  { %433 = vmatpush.bf16.msrb.mxu0 %v1939_v13 }
  0x33   :  { %479 = vmatpush.bf16.msrb.mxu1 %v1935_v14 }
  0x34   :  { %537 = vmatpush.bf16.msrb.mxu2 %v1943_v15 }
  0x35   :  { %561 = vmatpush.bf16.msrb.mxu3 %v1939_v13  ;;  %v1990_v13 = vld [vmem:[%s2523_s3 + $0x158] sm:$0xff] }
  0x36   :  { %573 = vmatpush.bf16.msra.mxu0 %v470_v51  ;;  %v1971_v51 = vld [vmem:[%s2523_s3 + $0xc0] sm:$0xff] }
  0x37   :  { %591 = vmatpush.bf16.msra.mxu1 %v528_v52  ;;  %v1954_v52 = vld [vmem:[%s2523_s3 + $0x38] sm:$0xff] }
  0x38   :  { %691 = vmatpush.bf16.msra.mxu2 %v1960_v16 }
  0x39   :  { %749 = vmatpush.bf16.msra.mxu3 %v1953_v17 }
  0x3a   :  { %574 = vmatpush.bf16.msra.mxu0 %v1938_v54  ;;  %v1947_v54 = vld [vmem:[%s2523_s3] sm:$0xff] }
  0x3b   :  { %592 = vmatpush.bf16.msra.mxu1 %v1946_v55  ;;  %v1961_v55 = vld [vmem:[%s2523_s3 + $0x70] sm:$0xff] }
  0x3c   :  { %692 = vmatpush.bf16.msra.mxu2 %v1959_v18  ;;  %v1982_v18 = vld [vmem:[%s2523_s3 + $0x118] sm:$0xff] }
  0x3d   :  { %750 = vmatpush.bf16.msra.mxu3 %v1952_v19 }
  0x3e   :  { %575 = vmatpush.bf16.msra.mxu0 %v1937_v57  ;;  %v1988_v57 = vld [vmem:[%s2523_s3 + $0x148] sm:$0xff] }
  0x3f   :  { %593 = vmatpush.bf16.msra.mxu1 %v1945_v58  ;;  %v1995_v58 = vld [vmem:[%s2523_s3 + $0x180] sm:$0xff] }
  0x40   :  { %693 = vmatpush.bf16.msra.mxu2 %v1958_v36 }
  0x41   :  { %751 = vmatpush.bf16.msra.mxu3 %v1951_v37 }
  0x42   :  { %576 = vmatpush.bf16.msra.mxu0 %v1936_v11  ;;  %v1976_v11 = vld [vmem:[%s2523_s3 + $0xe8] sm:$0xff] }
  0x43   :  { %594 = vmatpush.bf16.msra.mxu1 %v1944_v12  ;;  %v1983_v12 = vld [vmem:[%s2523_s3 + $0x120] sm:$0xff] }
  0x44   :  { %694 = vmatpush.bf16.msra.mxu2 %v1957_v40 }
  0x45   :  { %752 = vmatpush.bf16.msra.mxu3 %v1950_v41 }
  0x46   :  { %577 = vmatpush.bf16.msra.mxu0 %v1935_v14  ;;  %v1975_v14 = vld [vmem:[%s2523_s3 + $0xe0] sm:$0xff] }
  0x47   :  { %595 = vmatpush.bf16.msra.mxu1 %v1943_v15 }
  0x48   :  { %695 = vmatpush.bf16.msra.mxu2 %v1956_v44 }
  0x49   :  { %753 = vmatpush.bf16.msra.mxu3 %v1949_v45 }
  0x4c   :  { %696 = vmatpush.bf16.msra.mxu2 %v1955_v48 }
  0x4d   :  { %754 = vmatpush.bf16.msra.mxu3 %v1948_v49 }
  0x50   :  { %697 = vmatpush.bf16.msra.mxu2 %v1954_v52 }
  0x51   :  { %755 = vmatpush.bf16.msra.mxu3 %v1947_v54 }
  0x9e   :  { %v128_v60 = vpop.f32.mrf.mxu0 }
  0x9f   :  { %v189_v61 = vpop.f32.mrf.mxu1 }
  0xa0   :  { %v190_v62 = vadd.f32 %v189_v61, %v128_v60  ;;  %v1969_v60 = vld [vmem:[%s2523_s3 + $0xb0] sm:$0xff]  ;;  %v1987_v61 = vld [vmem:[%s2523_s3 + $0x140] sm:$0xff] }
  0xa2   :  { %v194_v63 = vadd.f32 %v2004_v59, %v190_v62  ;;  %v1994_v62 = vld [vmem:[%s2523_s3 + $0x178] sm:$0xff] }
  0xa4   :  { %v195_v0 = vmax.f32 %v194_v63, 0.0  ;;  %v1979_v63 = vld [vmem:[%s2523_s3 + $0x100] sm:$0xff] }
  0xa6   :  { %v296_v1 = vpop.f32.mrf.mxu2  ;;  %197 = vrot.lane.b32.xlu0 %v195_v0, %s2033_s15  ;;  %v130_v4 = vpop.f32.mrf.mxu0  ;;  %v1968_v0 = vld [vmem:[%s2523_s3 + $0xa8] sm:$0xff] }
  0xa7   :  { %v357_v2 = vpop.f32.mrf.mxu3  ;;  %v191_v5 = vpop.f32.mrf.mxu1  ;;  %v1985_v4 = vld [vmem:[%s2523_s3 + $0x130] sm:$0xff] }
  0xa8   :  { %v358_v3 = vadd.f32 %v357_v2, %v296_v1  ;;  %v1986_v1 = vld [vmem:[%s2523_s3 + $0x138] sm:$0xff]  ;;  %v1993_v2 = vld [vmem:[%s2523_s3 + $0x170] sm:$0xff]  ;;  %v1992_v5 = vld [vmem:[%s2523_s3 + $0x168] sm:$0xff] }
  0xaa   :  { %v361_v6 = vadd.f32 %v2004_v59, %v358_v3  ;;  %v1980_v59 = vld [vmem:[%s2523_s3 + $0x108] sm:$0xff]  ;;  %v1978_v3 = vld [vmem:[%s2523_s3 + $0xf8] sm:$0xff] }
  0xac   :  { %v362_v7 = vmax.f32 %v361_v6, 0.0  ;;  %v1977_v6 = vld [vmem:[%s2523_s3 + $0xf0] sm:$0xff] }
  0xae   :  { %v298_v8 = vpop.f32.mrf.mxu2  ;;  %364 = vrot.lane.b32.xlu0 %v362_v7, %s2033_s15 }
  0xaf   :  { %v359_v9 = vpop.f32.mrf.mxu3 }
  0xb0   :  { %v1984_v9 = vld [vmem:[%s2523_s3 + $0x128] sm:$0xff] }
 0x118   :  { %v198_v20 = vpop.permute.xlu0 %197 }
 0x119   :  { %201 = vst.msk [vmem:[#allocation2 + $0x1] sm:$0x7f] %vm200_vm3, %v198_v20  ;;  %v1989_v20 = vld [vmem:[%s2523_s3 + $0x150] sm:$0xff] }
 0x120   :  { %v365_v22 = vpop.permute.xlu0 %364  ;;  %v380_v23 = vld [vmem:[#allocation2 + $0x1] sm:$0x7f] }
 0x121   :  { %v369_v24 = vld [vmem:[#allocation2] sm:$0x7f]  ;;  %368 = vst.msk [vmem:[#allocation2 + $0x11] sm:$0x7f] %vm200_vm3, %v365_v22  ;;  %v381_v26 = vpack.c.bf16 %v380_v23, %v380_v23 }
 0x122   :  { %v485_v25 = vld [vmem:[#allocation2 + $0x2] sm:$0x7f]  ;;  %v370_v27 = vpack.c.bf16 %v369_v24, %v369_v24  ;;  %v2005_v22 = vld [vmem:[%s2521_s5 + $0x1] ss:$0 sm:$0xff] }
 0x123   :  { %v486_v28 = vpack.c.bf16 %v485_v25, %v485_v25  ;;  %1560 = vmatmul.msk.bf16.vlgmr.msrb.gmra.mxu0 %vm28_vm0, %v381_v26 }
 0x124   :  { %1577 = vmatmul.msk.bf16.vlgmr.msrb.gmra.mxu1 %vm28_vm0, %v370_v27  ;;  %828 = vmatpush.bf16.msrb.mxu0 %v1967_v21 }
 0x125   :  { %1603 = vmatmul.msk.bf16.vlgmr.msrb.gmra.mxu2 %vm28_vm0, %v486_v28  ;;  %908 = vmatpush.bf16.msrb.mxu1 %v1974_v39 }
 0x126   :  { %988 = vmatpush.bf16.msrb.mxu2 %v1981_v53 }
 0x128   :  { %v549_v30 = vld [vmem:[#allocation2 + $0x11] sm:$0x7f]  ;;  %829 = vmatpush.bf16.msrb.mxu0 %v1966_v29 }
 0x129   :  { %v550_v31 = vpack.c.bf16 %v549_v30, %v549_v30  ;;  %v547_v32 = vld [vmem:[#allocation2 + $0x10] sm:$0x7f]  ;;  %909 = vmatpush.bf16.msrb.mxu1 %v1973_v43 }
 0x12a   :  { %v583_v33 = vld [vmem:[#allocation2 + $0x12] sm:$0x7f]  ;;  %v548_v34 = vpack.c.bf16 %v547_v32, %v547_v32  ;;  %989 = vmatpush.bf16.msrb.mxu2 %v1980_v59 }
 0x12b   :  { %1604 = vmatmul.msk.bf16.vlgmr.msrb.gmra.mxu3 %vm28_vm0, %v550_v31  ;;  %v584_v35 = vpack.c.bf16 %v583_v33, %v583_v33 }
 0x12c   :  { %830 = vmatpush.bf16.msrb.mxu0 %v1965_v38  ;;  %1068 = vmatpush.bf16.msrb.mxu3 %v1988_v57 }
 0x12d   :  { %910 = vmatpush.bf16.msrb.mxu1 %v1972_v47 }
 0x12e   :  { %990 = vmatpush.bf16.msrb.mxu2 %v1979_v63  ;;  %v1996_v63 = vld [vmem:[%s2524_s4] sm:$0xff] }
 0x130   :  { %831 = vmatpush.bf16.msrb.mxu0 %v1964_v42  ;;  %1069 = vmatpush.bf16.msrb.mxu3 %v1987_v61 }
 0x131   :  { %911 = vmatpush.bf16.msrb.mxu1 %v1971_v51 }
 0x132   :  { %991 = vmatpush.bf16.msrb.mxu2 %v1978_v3 }
 0x133   :  { %1605 = vmatmul.msk.bf16.vlgmr.msra.gmra.mxu0 %vm28_vm0, %v548_v34 }
 0x134   :  { %1606 = vmatmul.msk.bf16.vlgmr.msra.gmra.mxu1 %vm28_vm0, %v584_v35  ;;  %832 = vmatpush.bf16.msrb.mxu0 %v1963_v46 }
 0x135   :  { %912 = vmatpush.bf16.msrb.mxu1 %v1970_v56  ;;  %1070 = vmatpush.bf16.msrb.mxu3 %v1986_v1 }
 0x136   :  { %992 = vmatpush.bf16.msrb.mxu2 %v1977_v6 }
 0x138   :  { %833 = vmatpush.bf16.msrb.mxu0 %v1962_v50 }
 0x139   :  { %913 = vmatpush.bf16.msrb.mxu1 %v1969_v60  ;;  %1071 = vmatpush.bf16.msrb.mxu3 %v1985_v4 }
 0x13a   :  { %993 = vmatpush.bf16.msrb.mxu2 %v1976_v11 }
 0x13c   :  { %834 = vmatpush.bf16.msrb.mxu0 %v1961_v55 }
 0x13d   :  { %914 = vmatpush.bf16.msrb.mxu1 %v1968_v0  ;;  %1072 = vmatpush.bf16.msrb.mxu3 %v1984_v9 }
 0x13e   :  { %994 = vmatpush.bf16.msrb.mxu2 %v1975_v14 }
 0x140   :  { %1148 = vmatpush.bf16.msra.mxu0 %v1995_v58 }
 0x141   :  { %1073 = vmatpush.bf16.msrb.mxu3 %v1983_v12 }
 0x144   :  { %1149 = vmatpush.bf16.msra.mxu0 %v1994_v62  ;;  %v1997_v62 = vld [vmem:[%s2524_s4 + $0x8] sm:$0xff] }
 0x145   :  { %1074 = vmatpush.bf16.msrb.mxu3 %v1982_v18  ;;  %1192 = vmatpush.bf16.msra.mxu1 %v1997_v62 }
 0x148   :  { %1150 = vmatpush.bf16.msra.mxu0 %v1993_v2 }
 0x149   :  { %1193 = vmatpush.bf16.msra.mxu1 %v1996_v63 }
 0x14c   :  { %1151 = vmatpush.bf16.msra.mxu0 %v1992_v5 }
 0x150   :  { %1152 = vmatpush.bf16.msra.mxu0 %v1991_v10 }
 0x154   :  { %1153 = vmatpush.bf16.msra.mxu0 %v1990_v13 }
 0x158   :  { %1154 = vmatpush.bf16.msra.mxu0 %v1989_v20 }
 0x1a0   :  { %v435_v7 = vpop.f32.mrf.mxu0 }
 0x1a1   :  { %v481_v8 = vpop.f32.mrf.mxu1 }
 0x1a2   :  { %v482_v19 = vadd.f32 %v481_v8, %v435_v7 }
 0x1a8   :  { %v539_v15 = vpop.f32.mrf.mxu2  ;;  %v437_v16 = vpop.f32.mrf.mxu0 }
 0x1a9   :  { %v483_v17 = vpop.f32.mrf.mxu1  ;;  %v543_v21 = vadd.f32 %v539_v15, %v482_v19  ;;  %v2006_v16 = vld [vmem:[%s2521_s5 + $0x2] ss:$0 sm:$0xff] }
 0x1ab   :  { %v545_v24 = vadd.f32 %v2005_v22, %v543_v21 }
 0x1ad   :  { %v546_v29 = vmax.f32 %v545_v24, 0.0  ;;  %v2007_v24 = vld [vmem:[%s2521_s5 + $0x3] ss:$0 sm:$0xff]  ;;  %s2034_s5 = smov 122  }
 0x1ae   :  { %v563_v23 = vpop.f32.mrf.mxu3 }
 0x1af   :  { %v625_v34 = vrot.slane %v546_v29, 1  ;;  %v761_v37 = vrot.slane %v546_v29, 2  ;;  %v841_v38 = vrot.slane %v546_v29, 3  ;;  %v921_v51 = vrot.slane %v546_v29, 4 }
 0x1b0   :  { %v541_v25 = vpop.f32.mrf.mxu2  ;;  %v579_v26 = vpop.f32.mrf.mxu0  ;;  %v1001_v55 = vrot.slane %v546_v29, 5  ;;  %v1081_v56 = vrot.slane %v546_v29, 6 }
 0x1b1   :  { %v597_v27 = vpop.f32.mrf.mxu1  ;;  %v580_v28 = vadd.f32 %v579_v26, %v563_v23 }
 0x1b3   :  { %v601_v30 = vadd.f32 %v597_v27, %v580_v28 }
 0x1b5   :  { %v602_v31 = vadd.f32 %v2005_v22, %v601_v30 }
 0x1b6   :  { %v565_v32 = vpop.f32.mrf.mxu3 }
 0x1b7   :  { %v603_v33 = vmax.f32 %v602_v31, 0.0 }
 0x1b8   :  { %v581_v35 = vpop.f32.mrf.mxu0 }
 0x1b9   :  { %v599_v36 = vpop.f32.mrf.mxu1  ;;  %v627_v39 = vsel %vm607_vm4, %v625_v34, %v603_v33  ;;  %v605_v40 = vrot.slane %v603_v33, 7  ;;  %v763_v41 = vrot.slane %v603_v33, 1  ;;  %v843_v42 = vrot.slane %v603_v33, 2 }
 0x1ba   :  { %v628_v43 = vpack.c.bf16 %v627_v39, %v627_v39  ;;  %v923_v50 = vrot.slane %v603_v33, 3  ;;  %v1003_v52 = vrot.slane %v603_v33, 4  ;;  %v1083_v53 = vrot.slane %v603_v33, 5 }
 0x1bb   :  { %v608_v44 = vsel %vm607_vm4, %v546_v29, %v605_v40  ;;  %v765_v45 = vsel %vm607_vm4, %v761_v37, %v763_v41  ;;  %v845_v46 = vsel %vm607_vm4, %v841_v38, %v843_v42 }
 0x1bc   :  { %1649 = vmatmul.msk.bf16.vlgmr.msra.gmra.mxu2 %vm686_vm5, %v628_v43  ;;  %v609_v47 = vpack.c.bf16 %v608_v44, %v608_v44  ;;  %v766_v48 = vpack.c.bf16 %v765_v45, %v765_v45  ;;  %v846_v49 = vpack.c.bf16 %v845_v46, %v845_v46  ;;  %v925_v54 = vsel %vm607_vm4, %v921_v51, %v923_v50 }
 0x1bd   :  { %v1005_v57 = vsel %vm607_vm4, %v1001_v55, %v1003_v52  ;;  %v1085_v58 = vsel %vm607_vm4, %v1081_v56, %v1083_v53  ;;  %v926_v59 = vpack.c.bf16 %v925_v54, %v925_v54 }
 0x1be   :  { %1678 = vmatmul.msk.bf16.vlgmr.msra.gmra.mxu3 %vm686_vm5, %v609_v47  ;;  %1721 = vmatmul.msk.bf16.vlgmr.msrb.gmra.mxu0 %vm686_vm5, %v766_v48  ;;  %v1006_v60 = vpack.c.bf16 %v1005_v57, %v1005_v57  ;;  %v1086_v61 = vpack.c.bf16 %v1085_v58, %v1085_v58 }
 0x1bf   :  { %1764 = vmatmul.msk.bf16.vlgmr.msrb.gmra.mxu1 %vm686_vm5, %v846_v49 }
 0x1cc   :  { %1807 = vmatmul.msk.bf16.vlgmr.msrb.gmra.mxu2 %vm686_vm5, %v926_v59 }
 0x1ce   :  { %1850 = vmatmul.msk.bf16.vlgmr.msrb.gmra.mxu3 %vm686_vm5, %v1006_v60  ;;  %1893 = vmatmul.msk.bf16.vlgmr.msra.gmra.mxu0 %vm686_vm5, %v1086_v61 }
 0x23b   :  { %v836_v0 = vpop.f32.mrf.mxu0 }
 0x23c   :  { %v916_v1 = vpop.f32.mrf.mxu1 }
 0x23f   :  { %v699_v2 = vpop.f32.mrf.mxu2 }
 0x241   :  { %v757_v3 = vpop.f32.mrf.mxu3 }
 0x242   :  { %v758_v6 = vadd.f32 %v757_v3, %v699_v2 }
 0x243   :  { %v838_v4 = vpop.f32.mrf.mxu0 }
 0x244   :  { %v918_v5 = vpop.f32.mrf.mxu1  ;;  %v840_v9 = vadd.f32 %v836_v0, %v758_v6 }
 0x246   :  { %v920_v11 = vadd.f32 %v916_v1, %v840_v9 }
 0x247   :  { %v701_v7 = vpop.f32.mrf.mxu2 }
 0x249   :  { %v759_v8 = vpop.f32.mrf.mxu3 }
 0x24b   :  { %v1156_v10 = vpop.f32.mrf.mxu0 }
 0x24f   :  { %v996_v12 = vpop.f32.mrf.mxu2 }
 0x250   :  { %v1000_v13 = vadd.f32 %v996_v12, %v920_v11 }
 0x251   :  { %v1076_v14 = vpop.f32.mrf.mxu3 }
 0x252   :  { %v1080_v15 = vadd.f32 %v1076_v14, %v1000_v13 }
 0x253   :  { %v1158_v17 = vpop.f32.mrf.mxu0 }
 0x254   :  { %v1160_v18 = vadd.f32 %v1156_v10, %v1080_v15 }
 0x256   :  { %v1162_v19 = vadd.f32 %v2006_v16, %v1160_v18 }
 0x257   :  { %v998_v20 = vpop.f32.mrf.mxu2 }
 0x258   :  { %v1163_v21 = vmax.f32 %v1162_v19, 0.0 }
 0x259   :  { %v1078_v22 = vpop.f32.mrf.mxu3 }
 0x25a   :  { %v1164_v23 = vpack.c.bf16 %v1163_v21, %v1163_v21 }
 0x25c   :  { %1902 = vmatmul.msk.bf16.vlgmr.msra.gmra.mxu1 %vm1182_vm6, %v1164_v23 }
 0x2d9   :  { %v1195_v25 = vpop.f32.mrf.mxu1 }
 0x2da   :  { %v2413_v26 = vadd.f32 %v2007_v24, %v1195_v25 }
 0x2dc   :  { %v1286_v27 = vsel %vm1285_vm7, %v2413_v26, -inf  ;;  %v1226_v28 = vsel %vm1225_vm8, %v2413_v26, -inf  ;;  %v1200_v29 = vsel %vm1199_vm9, %v2413_v26, -inf  ;;  %v1339_v31 = vsel %vm1338_vm10, %v2413_v26, -inf }
 0x2dd   :  { %1287 = vmax.xlane.f32.xlu2 %v1286_v27  ;;  %1227 = vmax.xlane.f32.xlu1 %v1226_v28  ;;  %v1256_v32 = vsel %vm1255_vm11, %v2413_v26, -inf  ;;  %v1317_v10 = vsub.f32 0.0, %v2413_v26 }
 0x2de   :  { %1201 = vmax.xlane.f32.xlu0 %v1200_v29 }
 0x2df   :  { %v1318_v11 = vmul.f32 1.442695, %v1317_v10 }
 0x2e1   :  { %v1197_v30 = vpop.f32.mrf.mxu1 }
 0x2e5   :  { %1340 = vmax.xlane.f32.xlu2 %v1339_v31  ;;  %1257 = vmax.xlane.f32.xlu1 %v1256_v32 }
 0x350   :  { %v1288_v33 = vpop.xlane.xlu2 %1287  ;;  %v1228_v34 = vpop.xlane.xlu1 %1227 }
 0x351   :  { %v1229_v35 = vsub.f32 %v2413_v26, %v1228_v34  ;;  %v1289_v44 = vsub.f32 %v2413_v26, %v1288_v33  ;;  %v1202_v49 = vpop.xlane.xlu0 %1201 }
 0x352   :  { %v1203_v50 = vsub.f32 %v2413_v26, %v1202_v49 }
 0x353   :  { %v1230_v36 = vmul.f32 1.442695, %v1229_v35  ;;  %v1290_v45 = vmul.f32 1.442695, %v1289_v44 }
 0x354   :  { %v1204_v51 = vmul.f32 1.442695, %v1203_v50 }
 0x355   :  { %2008 = vpow2.f32 %v1230_v36 }
 0x358   :  { %v1341_v37 = vpop.xlane.xlu2 %1340  ;;  %v1258_v38 = vpop.xlane.xlu1 %1257 }
 0x359   :  { %v1342_v39 = vsub.f32 %v2413_v26, %v1341_v37  ;;  %v1259_v40 = vsub.f32 %v2413_v26, %v1258_v38 }
 0x35b   :  { %v1343_v41 = vmul.f32 1.442695, %v1342_v39  ;;  %v1260_v42 = vmul.f32 1.442695, %v1259_v40  ;;  %v2428_v43 = vpop.eup %2008 }
 0x35c   :  { %1233 = vrot.lane.b32.xlu1 %v2428_v43, %s2034_s5 }
 0x35d   :  { %2010 = vpow2.f32 %v1343_v41 }
 0x35e   :  { %2012 = vpow2.f32 %v1260_v42 }
 0x35f   :  { %2014 = vpow2.f32 %v1290_v45 }
 0x360   :  { %2016 = vpow2.f32 %v1204_v51 }
 0x363   :  { %v2432_v46 = vpop.eup %2010 }
 0x364   :  { %v2434_v47 = vpop.eup %2012  ;;  %1346 = vrot.lane.b32.xlu1 %v2432_v46, %s2035_s24 }
 0x365   :  { %1263 = vrot.lane.b32.xlu2 %v2434_v47, %s2036_s25  ;;  %v2438_v48 = vpop.eup %2014 }
 0x366   :  { %v2017_v52 = vpop.eup %2016 }
 0x367   :  { %v1206_v53 = vsel %vm1199_vm9, %v2017_v52, 0.0 }
 0x36d   :  { %1293 = vrot.lane.b32.xlu2 %v2438_v48, %s2037_s26 }
 0x396   :  { %1207 = vadd.xlane.f32.xlu2 %v1206_v53 }
 0x3bf   :  { %v1264_v54 = vpop.permute.xlu2 %1263 }
 0x3c0   :  { %v1266_v55 = vsel %vm1199_vm9, %v1264_v54, 0.0 }
 0x3c1   :  { %1267 = vadd.xlane.f32.xlu0 %v1266_v55 }
 0x3c7   :  { %v1294_v56 = vpop.permute.xlu2 %1293 }
 0x3c8   :  { %v1296_v57 = vsel %vm1199_vm9, %v1294_v56, 0.0 }
 0x3c9   :  { %1297 = vadd.xlane.f32.xlu0 %v1296_v57 }
 0x3ce   :  { %v1234_v58 = vpop.permute.xlu1 %1233 }
 0x3cf   :  { %v1236_v59 = vsel %vm1199_vm9, %v1234_v58, 0.0 }
 0x3d0   :  { %1237 = vadd.xlane.f32.xlu1 %v1236_v59 }
 0x3d6   :  { %v1347_v60 = vpop.permute.xlu1 %1346 }
 0x3d7   :  { %v1350_v61 = vsel %vm1349_vm12, %v1347_v60, 0.0 }
 0x3d8   :  { %1351 = vadd.xlane.f32.xlu0 %v1350_v61 }
 0x409   :  { %v1208_v62 = vpop.xlane.xlu2 %1207 }
 0x40a   :  { %2018 = vrcp.f32 %v1208_v62  ;;  %v1220_v2 = vand.u32 2147483648, %v1208_v62  ;;  %v1218_v4 = vand.u32 2147483647, %v1208_v62  ;;  %vm1214_vm14 = vweird.f32 %v1208_v62 }
 0x40b   :  { %2020 = vpow2.f32 %v1318_v11 }
 0x40c   :  { %v1221_v6 = vor.u32 1.1754944e-38, %v1220_v2  ;;  %vm1219_vm0 = vcmp.eq.f32.partialorder %v1218_v4, 8.507059e+37 }
 0x410   :  { %v2019_v63 = vpop.eup %2018 }
 0x411   :  { %v1210_v0 = vmul.f32 %v2019_v63, %v1208_v62  ;;  %vm1215_vm13 = vweird.f32 %v2019_v63  ;;  %v2021_v12 = vpop.eup %2020 }
 0x412   :  { %vm1216_vm15 = vmor %vm1214_vm14, %vm1215_vm13  ;;  %v2451_v14 = vadd.f32 1.0, %v2021_v12 }
 0x413   :  { %v1211_v1 = vsub.f32 1.0, %v1210_v0 }
 0x414   :  { %v1332_v62 = vand.u32 2147483648, %v2451_v14 }
 0x415   :  { %v1212_v3 = vmul.f32 %v2019_v63, %v1211_v1  ;;  %v1330_v1 = vand.u32 2147483647, %v2451_v14 }
 0x417   :  { %v1213_v5 = vadd.f32 %v2019_v63, %v1212_v3 }
 0x419   :  { %v1217_v7 = vsel %vm1216_vm15, %v2019_v63, %v1213_v5 }
 0x41a   :  { %v1222_v8 = vsel %vm1219_vm0, %v1221_v6, %v1217_v7 }
 0x41b   :  { %v1223_v9 = vmul.f32 %v2017_v52, %v1222_v8 }
 0x41d   :  { %1224 = vst.msk [vmem:[%s2525_s6] sm:$0x3] %vm1199_vm9, %v1223_v9 }
 0x434   :  { %v1268_v13 = vpop.xlane.xlu0 %1267 }
 0x435   :  { %2022 = vrcp.f32 %v1268_v13  ;;  %vm1274_vm1 = vweird.f32 %v1268_v13  ;;  %v1280_v34 = vand.u32 2147483648, %v1268_v13  ;;  %v1278_v37 = vand.u32 2147483647, %v1268_v13 }
 0x436   :  { %2024 = vrcp.f32 %v2451_v14 }
 0x437   :  { %v1281_v51 = vor.u32 1.1754944e-38, %v1280_v34  ;;  %vm1279_vm14 = vcmp.eq.f32.partialorder %v1278_v37, 8.507059e+37 }
 0x43b   :  { %v2023_v16 = vpop.eup %2022 }
 0x43c   :  { %v1298_v15 = vpop.xlane.xlu0 %1297  ;;  %v2454_v17 = vpop.eup %2024  ;;  %v1270_v18 = vmul.f32 %v2023_v16, %v1268_v13  ;;  %vm1275_vm2 = vweird.f32 %v2023_v16 }
 0x43d   :  { %2026 = vrcp.f32 %v1298_v15  ;;  %v1322_v22 = vmul.f32 %v2454_v17, %v2451_v14  ;;  %v1308_v38 = vand.u32 2147483647, %v1298_v15  ;;  %v1310_v39 = vand.u32 2147483648, %v1298_v15  ;;  %vm2462_vm4 = vmor %vm1274_vm1, %vm1275_vm2 }
 0x43e   :  { %v1271_v23 = vsub.f32 1.0, %v1270_v18  ;;  %vm1304_vm5 = vweird.f32 %v1298_v15  ;;  %vm1327_vm12 = vweird.f32 %v2454_v17  ;;  %vm1326_vm2 = vweird.f32 %v2451_v14 }
 0x43f   :  { %v1323_v25 = vsub.f32 1.0, %v1322_v22  ;;  %vm1309_vm15 = vcmp.eq.f32.partialorder %v1308_v38, 8.507059e+37  ;;  %v1311_v55 = vor.u32 1.1754944e-38, %v1310_v39 }
 0x440   :  { %v1272_v27 = vmul.f32 %v2023_v16, %v1271_v23 }
 0x441   :  { %v1324_v31 = vmul.f32 %v2454_v17, %v1323_v25 }
 0x442   :  { %v1273_v33 = vadd.f32 %v2023_v16, %v1272_v27 }
 0x443   :  { %v2027_v19 = vpop.eup %2026  ;;  %v1238_v21 = vpop.xlane.xlu1 %1237  ;;  %v1325_v50 = vadd.f32 %v2454_v17, %v1324_v31 }
 0x444   :  { %v1300_v20 = vmul.f32 %v2027_v19, %v1298_v15  ;;  %2028 = vrcp.f32 %v1238_v21  ;;  %vm1305_vm3 = vweird.f32 %v2027_v19  ;;  %v1250_v40 = vand.u32 2147483648, %v1238_v21 }
 0x445   :  { %v1248_v44 = vand.u32 2147483647, %v1238_v21  ;;  %v1277_v45 = vsel %vm2462_vm4, %v2023_v16, %v1273_v33  ;;  %vm2468_vm9 = vmor %vm1304_vm5, %vm1305_vm3  ;;  %vm1244_vm13 = vweird.f32 %v1238_v21  ;;  %vm1315_vm4 = vcmask 222400  }
 0x446   :  { %v1301_v24 = vsub.f32 1.0, %v1300_v20  ;;  %v1251_v56 = vor.u32 1.1754944e-38, %v1250_v40  ;;  %v1282_v57 = vsel %vm1279_vm14, %v1281_v51, %v1277_v45  ;;  %vm2482_vm3 = vmor %vm1326_vm2, %vm1327_vm12 }
 0x447   :  { %vm1249_vm1 = vcmp.eq.f32.partialorder %v1248_v44, 8.507059e+37  ;;  %v1283_v3 = vmul.f32 %v2434_v47, %v1282_v57  ;;  %v1329_v4 = vsel %vm2482_vm3, %v2454_v17, %v1325_v50  ;;  %v1333_v47 = vor.u32 1.1754944e-38, %v1332_v62 }
 0x448   :  { %v1302_v28 = vmul.f32 %v2027_v19, %v1301_v24 }
 0x44a   :  { %v2029_v29 = vpop.eup %2028  ;;  %v1303_v35 = vadd.f32 %v2027_v19, %v1302_v28 }
 0x44b   :  { %v1240_v30 = vmul.f32 %v2029_v29, %v1238_v21  ;;  %v2459_v32 = vpop.xlane.xlu0 %1351  ;;  %vm1245_vm6 = vweird.f32 %v2029_v29 }
 0x44c   :  { %2030 = vrcp.f32 %v2459_v32  ;;  %v1307_v52 = vsel %vm2468_vm9, %v2027_v19, %v1303_v35  ;;  %vm1246_vm0 = vmor %vm1244_vm13, %vm1245_vm6  ;;  %v1364_v5 = vand.u32 2147483648, %v2459_v32  ;;  %v1362_v7 = vand.u32 2147483647, %v2459_v32 }
 0x44d   :  { %v1241_v36 = vsub.f32 1.0, %v1240_v30  ;;  %v1312_v60 = vsel %vm1309_vm15, %v1311_v55, %v1307_v52  ;;  %vm1336_vm6 = vcmask 255200   ;;  %vm1331_vm9 = vcmp.eq.f32.partialorder %v1330_v1, 8.507059e+37 }
 0x44e   :  { %v1334_v8 = vsel %vm1331_vm9, %v1333_v47, %v1329_v4  ;;  %v1365_v9 = vor.u32 1.1754944e-38, %v1364_v5 }
 0x44f   :  { %v1242_v42 = vmul.f32 %v2029_v29, %v1241_v36 }
 0x451   :  { %v1243_v53 = vadd.f32 %v2029_v29, %v1242_v42 }
 0x452   :  { %v2031_v54 = vpop.eup %2030 }
 0x453   :  { %v1247_v58 = vsel %vm1246_vm0, %v2029_v29, %v1243_v53  ;;  %v1354_v59 = vmul.f32 %v2031_v54, %v2459_v32  ;;  %vm1359_vm5 = vweird.f32 %v2031_v54 }
 0x454   :  { %v1252_v61 = vsel %vm1249_vm1, %v1251_v56, %v1247_v58 }
 0x455   :  { %v1253_v63 = vmul.f32 %v2428_v43, %v1252_v61  ;;  %v1355_v2 = vsub.f32 1.0, %v1354_v59  ;;  %v1313_v43 = vmul.f32 %v2438_v48, %v1312_v60 }
 0x457   :  { %1254 = vst.msk [vmem:[%s2525_s6] sm:$0x3] %vm1225_vm8, %v1253_v63  ;;  %v1356_v6 = vmul.f32 %v2031_v54, %v1355_v2  ;;  %vm1358_vm8 = vweird.f32 %v2459_v32 }
 0x458   :  { %1284 = vst.msk [vmem:[%s2525_s6] sm:$0x3] %vm1255_vm11, %v1283_v3  ;;  %vm1360_vm12 = vmor %vm1358_vm8, %vm1359_vm5  ;;  %vm1363_vm11 = vcmp.eq.f32.partialorder %v1362_v7, 8.507059e+37 }
 0x459   :  { %1314 = vst.msk [vmem:[%s2525_s6] sm:$0x3] %vm1285_vm7, %v1313_v43  ;;  %v1357_v48 = vadd.f32 %v2031_v54, %v1356_v6 }
 0x45a   :  { %1316 = vst.msk [vmem:[%s2525_s6] sm:$0x3] %vm1315_vm4, %v2413_v26 }
 0x45b   :  { %1337 = vst.msk [vmem:[%s2525_s6] sm:$0x3] %vm1336_vm6, %v1334_v8  ;;  %v1361_v10 = vsel %vm1360_vm12, %v2031_v54, %v1357_v48 }
 0x45c   :  { %v1366_v11 = vsel %vm1363_vm11, %v1365_v9, %v1361_v10 }
 0x45d   :  { %v1367_v12 = vmul.f32 %v2432_v46, %v1366_v11 }
 0x45f   :  { %1368 = vst.msk [vmem:[%s2525_s6] sm:$0x3] %vm1338_vm10, %v1367_v12 }

</bundles_post_ra>
